<compile_context>
chip_gen: v7x
topology: tpu7x:2x2x1
jax: 0.10.0
libtpu: 0.0.40
codegen_flags: <defaults>
</compile_context>

<pallas_src>
import functools

import jax
import jax.numpy as jnp
from jax.experimental import pallas as pl
from jax.experimental.pallas import tpu as pltpu

_GRAN = 512  # edge-tile granularity (keeps packed-row counts sublane aligned)


def _round_up(x, m):
    return ((x + m - 1) // m) * m


def _cdiv(a, b):
    return (a + b - 1) // b


def _vmem_limit_bytes():
    """Chip-aware scoped-VMEM limit: half of physical VMEM, capped at 64 MiB."""
    try:
        cap = pltpu.get_tpu_info().vmem_capacity_bytes
        return int(min(cap // 2, 64 * 1024 * 1024))   # v7x: 32 MiB, v5e/v6e: 64 MiB
    except Exception:
        return 32 * 1024 * 1024                        # safe everywhere


def edge_predictor_kernel(seg_ref, wsrc_ref, wdst_ref, bsum_ref, wsel_ref,
                          bout_ref, out_ref, *, neg_samples, pack):
    r = neg_samples + 1                       # pos + neg dst segments
    tmp = seg_ref.shape[1]                    # packed rows per tile
    lane_w = seg_ref.shape[2]                 # pack * dim_in (128 when packed)

    x = seg_ref[...]                          # (S, TMp, lane_w) f32
    x_src = x[0].astype(jnp.bfloat16)                               # (TMp, lane_w)
    x_dst = x[1:].astype(jnp.bfloat16).reshape(r * tmp, lane_w)     # (R*TMp, lane_w)

    # Block-diagonal projections: one bf16 MXU pass each, f32 accumulation.
    h_src = jnp.dot(x_src, wsrc_ref[...], preferred_element_type=jnp.float32)
    h_dst = jnp.dot(x_dst, wdst_ref[...], preferred_element_type=jnp.float32)
    h_dst = h_dst.reshape(r, tmp, lane_w)

    # Fold (b_src + b_dst) once into the src half, then relu(src + dst).
    h_src = h_src + bsum_ref[...]
    edges = jnp.maximum(h_src[None, :, :] + h_dst, 0.0)             # (R, TMp, lane_w)

    # out_fc as VPU multiply + lane reduction per pack slot (MXU stays free).
    parts = []
    for g in range(pack):
        w_g = wsel_ref[g, :]                  # w_out on lanes [g*D, (g+1)*D), else 0
        parts.append(jnp.sum(edges * w_g, axis=-1, keepdims=True))  # (R, TMp, 1)
    scores = jnp.concatenate(parts, axis=-1) if pack > 1 else parts[0]
    out_ref[...] = (scores + bout_ref[0, 0]).astype(out_ref.dtype)


def edge_predictor(h, params, neg_samples=1, tile_edges=8192):
    n_rows, dim_in = h.shape
    s = neg_samples + 2
    r = neg_samples + 1
    num_edge = n_rows // s
    # Like the torch module, h packs [src | pos_dst | neg_dst] rows.
    h = h[: s * num_edge]

    # Lane packing factor (falls back to 1 if dim_in does not divide 128).
    pack = 128 // dim_in if (dim_in <= 128 and 128 % dim_in == 0) else 1
    lane_w = pack * dim_in

    vmem_limit = _vmem_limit_bytes()

    # ---- edge-tile selection -------------------------------------------------
    chunks = _cdiv(num_edge, _GRAN)
    want = max(1, min(max(tile_edges, _GRAN) // _GRAN, chunks))
    if chunks > 1 and want >= chunks:
        want = _cdiv(chunks, 2)               # keep >=2 tiles: both v7x TCs get work
    # rough f32 bytes/edge of VMEM footprint (double-buffered input + temps)
    per_edge = 4 * dim_in * (2 * s + 1 + 2 * r) + 2 * dim_in * s
    while want > 1 and want * _GRAN * per_edge > int(0.7 * vmem_limit):
        want -= 1
    tile_e = want * _GRAN
    num_edge_pad = _round_up(num_edge, tile_e)
    n_tiles = num_edge_pad // tile_e
    tile_p = tile_e // pack                   # packed rows per tile

    # ---- pack data / weights ---------------------------------------------------
    seg = h.reshape(s, num_edge, dim_in)
    if num_edge_pad != num_edge:
        seg = jnp.pad(seg, ((0, 0), (0, num_edge_pad - num_edge), (0, 0)))
    seg = seg.reshape(s, num_edge_pad // pack, lane_w)   # contiguous reshape, free

    eye = jnp.eye(pack, dtype=jnp.float32)
    w_src_blk = jnp.kron(eye, params["w_src"]).astype(jnp.bfloat16)   # (lane_w, lane_w)
    w_dst_blk = jnp.kron(eye, params["w_dst"]).astype(jnp.bfloat16)   # (lane_w, lane_w)
    b_sum = jnp.tile(params["b_src"] + params["b_dst"], (1, pack))    # (1, lane_w)
    w_sel = jnp.kron(eye, params["w_out"].reshape(1, dim_in))         # (pack, lane_w)
    b_out = params["b_out"].reshape(1, 1)                             # scalar -> SMEM

    kernel = functools.partial(edge_predictor_kernel,
                               neg_samples=neg_samples, pack=pack)

    flops = (2 * s * num_edge_pad * dim_in * dim_in            # projections (useful MACs)
             + (3 + 2 * pack) * r * num_edge_pad * dim_in)     # add/relu/score
    bytes_accessed = (4 * seg.size
                      + 2 * (w_src_blk.size + w_dst_blk.size)
                      + 4 * (b_sum.size + w_sel.size + 1)
                      + 4 * r * num_edge_pad)

    scores = pl.pallas_call(
        kernel,
        grid=(n_tiles,),
        in_specs=[
            pl.BlockSpec((s, tile_p, lane_w), lambda i: (0, i, 0)),    # packed rows
            pl.BlockSpec((lane_w, lane_w), lambda i: (0, 0)),          # src block-diag W
            pl.BlockSpec((lane_w, lane_w), lambda i: (0, 0)),          # dst block-diag W
            pl.BlockSpec((1, lane_w), lambda i: (0, 0)),               # b_src + b_dst
            pl.BlockSpec((pack, lane_w), lambda i: (0, 0)),            # w_out selectors
            pl.BlockSpec(memory_space=pltpu.MemorySpace.SMEM),         # b_out scalar
        ],
        out_specs=pl.BlockSpec((r, tile_p, pack), lambda i: (0, i, 0)),
        out_shape=jax.ShapeDtypeStruct((r, num_edge_pad // pack, pack), jnp.float32),
        compiler_params=pltpu.CompilerParams(
            dimension_semantics=("parallel",),
            vmem_limit_bytes=int(vmem_limit),
        ),
        cost_estimate=pl.CostEstimate(flops=int(flops), transcendentals=0,
                                      bytes_accessed=int(bytes_accessed)),
    )(seg, w_src_blk, w_dst_blk, b_sum, w_sel, b_out)

    # Packed (R, E_pad/P, P) -> edge order; back to the torch (rows, 1) layout.
    scores = scores.reshape(r, num_edge_pad)[:, :num_edge]
    pos = scores[0].reshape(num_edge, 1)
    neg = scores[1:].reshape(neg_samples * num_edge, 1)
    return pos, neg


def init_params(key, dim_in):
    """Deterministic init matching torch.nn.Linear's U(-1/sqrt(in), 1/sqrt(in))."""
    ks = jax.random.split(key, 6)
    bound = 1.0 / jnp.sqrt(jnp.float32(dim_in))
    # Weights stored as [in, out] (already transposed vs torch's [out, in]).
    return {
        "w_src": jax.random.uniform(ks[0], (dim_in, dim_in), jnp.float32, -bound, bound),
        "b_src": jax.random.uniform(ks[1], (1, dim_in), jnp.float32, -bound, bound),
        "w_dst": jax.random.uniform(ks[2], (dim_in, dim_in), jnp.float32, -bound, bound),
        "b_dst": jax.random.uniform(ks[3], (1, dim_in), jnp.float32, -bound, bound),
        "w_out": jax.random.uniform(ks[4], (dim_in, 1), jnp.float32, -bound, bound),
        "b_out": jax.random.uniform(ks[5], (1, 1), jnp.float32, -bound, bound),
    }


def reference_forward(h, params, neg_samples=1):
    num_edge = h.shape[0] // (neg_samples + 2)
    h_src = h[:num_edge] @ params["w_src"] + params["b_src"]
    h_pos_dst = h[num_edge:2 * num_edge] @ params["w_dst"] + params["b_dst"]
    h_neg_dst = h[2 * num_edge:] @ params["w_dst"] + params["b_dst"]
    h_pos_edge = jnp.maximum(h_src + h_pos_dst, 0.0)
    h_neg_edge = jnp.maximum(jnp.tile(h_src, (neg_samples, 1)) + h_neg_dst, 0.0)
    return (h_pos_edge @ params["w_out"] + params["b_out"],
            h_neg_edge @ params["w_out"] + params["b_out"])


if __name__ == "__main__":
    dim_in = 32
    key = jax.random.PRNGKey(0)
    k_param, k1, k2, k3 = jax.random.split(key, 4)
    params = init_params(k_param, dim_in)

    # (num_edge, neg_samples, key): small demo shapes + one multi-tile case.
    cases = [(8, 1, k1), (8, 3, k2), (1000, 2, k3)]
    for num_edge, neg_samples, k_h in cases:
        n_rows = num_edge * (neg_samples + 2)   # packed [src | pos_dst | neg_dst]
        h = jax.random.normal(k_h, (n_rows, dim_in), dtype=jnp.float32)

        pos_out, neg_out = edge_predictor(h, params, neg_samples=neg_samples)
        jax.block_until_ready((pos_out, neg_out))

        ref_pos, ref_neg = reference_forward(h, params, neg_samples=neg_samples)
        assert pos_out.shape == (num_edge, 1)
        assert neg_out.shape == (num_edge * neg_samples, 1)
        # bf16 MXU operands (f32 accumulation) -> loosened parity tolerance.
        assert jnp.allclose(pos_out, ref_pos, atol=5e-2, rtol=5e-2)
        assert jnp.allclose(neg_out, ref_neg, atol=5e-2, rtol=5e-2)

    print("KERNEL_OK")
</pallas_src>

<mosaic_0001>
module attributes {stable_mosaic.version = 11 : i64} {
  func.func @edge_predictor_kernel(%arg0: i32, %arg1: memref<3x128x128xf32, #tpu.memory_space<vmem>>, %arg2: memref<128x128xbf16, #tpu.memory_space<vmem>>, %arg3: memref<128x128xbf16, #tpu.memory_space<vmem>>, %arg4: memref<1x128xf32, #tpu.memory_space<vmem>>, %arg5: memref<4x128xf32, #tpu.memory_space<vmem>>, %arg6: memref<1x1xf32, #tpu.memory_space<smem>>, %arg7: memref<2x128x4xf32, #tpu.memory_space<vmem>>) attributes {dimension_semantics = [#tpu.dimension_semantics<parallel>], iteration_bounds = array<i64: 1>, scalar_prefetch = 0 : i64, scratch_operands = 0 : i64, tpu.core_type = #tpu.core_type<tc>, window_params = [{transform_indices = @transform_0, window_bounds = array<i64: 3, 128, 128>}, {pipeline_mode = #tpu.pipeline_mode<synchronous>, transform_indices = @transform_1, window_bounds = array<i64: 128, 128>}, {pipeline_mode = #tpu.pipeline_mode<synchronous>, transform_indices = @transform_2, window_bounds = array<i64: 128, 128>}, {pipeline_mode = #tpu.pipeline_mode<synchronous>, transform_indices = @transform_3, window_bounds = array<i64: 1, 128>}, {pipeline_mode = #tpu.pipeline_mode<synchronous>, transform_indices = @transform_4, window_bounds = array<i64: 4, 128>}, {transform_indices = @transform_5, window_bounds = array<i64: 1, 1>}, {transform_indices = @transform_6, window_bounds = array<i64: 2, 128, 4>}]} {
    %c0 = arith.constant 0 : index
    %c0_0 = arith.constant 0 : index
    %c0_1 = arith.constant 0 : index
    %0 = vector.load %arg1[%c0, %c0_0, %c0_1] : memref<3x128x128xf32, #tpu.memory_space<vmem>>, vector<3x128x128xf32>
    %1 = vector.extract_strided_slice %0 {offsets = [0, 0, 0], sizes = [1, 128, 128], strides = [1, 1, 1]} : vector<3x128x128xf32> to vector<1x128x128xf32>
    %2 = vector.shape_cast %1 : vector<1x128x128xf32> to vector<128x128xf32>
    %3 = arith.truncf %2 : vector<128x128xf32> to vector<128x128xbf16>
    %4 = vector.extract_strided_slice %0 {offsets = [1, 0, 0], sizes = [2, 128, 128], strides = [1, 1, 1]} : vector<3x128x128xf32> to vector<2x128x128xf32>
    %5 = arith.truncf %4 : vector<2x128x128xf32> to vector<2x128x128xbf16>
    %6 = vector.shape_cast %5 : vector<2x128x128xbf16> to vector<256x128xbf16>
    %c0_2 = arith.constant 0 : index
    %c0_3 = arith.constant 0 : index
    %7 = vector.load %arg2[%c0_2, %c0_3] : memref<128x128xbf16, #tpu.memory_space<vmem>>, vector<128x128xbf16>
    %cst = arith.constant dense<0.000000e+00> : vector<128x128xf32>
    %8 = tpu.matmul %3, %7, %cst {dimension_numbers = #tpu.dot_dimension_numbers<[1], [0], [0], [1], [0, 0, 1, 1], [], []>} : vector<128x128xbf16>, vector<128x128xbf16>, vector<128x128xf32> -> vector<128x128xf32>
    %c0_4 = arith.constant 0 : index
    %c0_5 = arith.constant 0 : index
    %9 = vector.load %arg3[%c0_4, %c0_5] : memref<128x128xbf16, #tpu.memory_space<vmem>>, vector<128x128xbf16>
    %cst_6 = arith.constant dense<0.000000e+00> : vector<256x128xf32>
    %10 = tpu.matmul %6, %9, %cst_6 {dimension_numbers = #tpu.dot_dimension_numbers<[1], [0], [0], [1], [0, 0, 1, 1], [], []>} : vector<256x128xbf16>, vector<128x128xbf16>, vector<256x128xf32> -> vector<256x128xf32>
    %11 = vector.shape_cast %10 : vector<256x128xf32> to vector<2x128x128xf32>
    %c0_7 = arith.constant 0 : index
    %c0_8 = arith.constant 0 : index
    %12 = vector.load %arg4[%c0_7, %c0_8] : memref<1x128xf32, #tpu.memory_space<vmem>>, vector<1x128xf32>
    %13 = vector.broadcast %12 : vector<1x128xf32> to vector<128x128xf32>
    %14 = arith.addf %8, %13 : vector<128x128xf32>
    %15 = vector.shape_cast %14 : vector<128x128xf32> to vector<1x128x128xf32>
    %16 = vector.broadcast %15 : vector<1x128x128xf32> to vector<2x128x128xf32>
    %17 = arith.addf %16, %11 : vector<2x128x128xf32>
    %cst_9 = arith.constant 0.000000e+00 : f32
    %18 = vector.broadcast %cst_9 : f32 to vector<2x128x128xf32>
    %19 = arith.maximumf %17, %18 : vector<2x128x128xf32>
    %c0_10 = arith.constant 0 : index
    %c0_11 = arith.constant 0 : index
    %20 = vector.load %arg5[%c0_10, %c0_11] : memref<4x128xf32, #tpu.memory_space<vmem>>, vector<1x128xf32>
    %21 = vector.shape_cast %20 : vector<1x128xf32> to vector<128xf32>
    %22 = vector.shape_cast %21 : vector<128xf32> to vector<1x1x128xf32>
    %23 = vector.broadcast %22 : vector<1x1x128xf32> to vector<2x128x128xf32>
    %24 = arith.mulf %19, %23 : vector<2x128x128xf32>
    %cst_12 = arith.constant dense<0.000000e+00> : vector<2x128xf32>
    %25 = vector.multi_reduction <add>, %24, %cst_12 [2] : vector<2x128x128xf32> to vector<2x128xf32>
    %26 = vector.shape_cast %25 : vector<2x128xf32> to vector<2x128x1xf32>
    %c1 = arith.constant 1 : index
    %c0_13 = arith.constant 0 : index
    %27 = vector.load %arg5[%c1, %c0_13] : memref<4x128xf32, #tpu.memory_space<vmem>>, vector<1x128xf32>
    %28 = vector.shape_cast %27 : vector<1x128xf32> to vector<128xf32>
    %29 = vector.shape_cast %28 : vector<128xf32> to vector<1x1x128xf32>
    %30 = vector.broadcast %29 : vector<1x1x128xf32> to vector<2x128x128xf32>
    %31 = arith.mulf %19, %30 : vector<2x128x128xf32>
    %cst_14 = arith.constant dense<0.000000e+00> : vector<2x128xf32>
    %32 = vector.multi_reduction <add>, %31, %cst_14 [2] : vector<2x128x128xf32> to vector<2x128xf32>
    %33 = vector.shape_cast %32 : vector<2x128xf32> to vector<2x128x1xf32>
    %c2 = arith.constant 2 : index
    %c0_15 = arith.constant 0 : index
    %34 = vector.load %arg5[%c2, %c0_15] : memref<4x128xf32, #tpu.memory_space<vmem>>, vector<1x128xf32>
    %35 = vector.shape_cast %34 : vector<1x128xf32> to vector<128xf32>
    %36 = vector.shape_cast %35 : vector<128xf32> to vector<1x1x128xf32>
    %37 = vector.broadcast %36 : vector<1x1x128xf32> to vector<2x128x128xf32>
    %38 = arith.mulf %19, %37 : vector<2x128x128xf32>
    %cst_16 = arith.constant dense<0.000000e+00> : vector<2x128xf32>
    %39 = vector.multi_reduction <add>, %38, %cst_16 [2] : vector<2x128x128xf32> to vector<2x128xf32>
    %40 = vector.shape_cast %39 : vector<2x128xf32> to vector<2x128x1xf32>
    %c3 = arith.constant 3 : index
    %c0_17 = arith.constant 0 : index
    %41 = vector.load %arg5[%c3, %c0_17] : memref<4x128xf32, #tpu.memory_space<vmem>>, vector<1x128xf32>
    %42 = vector.shape_cast %41 : vector<1x128xf32> to vector<128xf32>
    %43 = vector.shape_cast %42 : vector<128xf32> to vector<1x1x128xf32>
    %44 = vector.broadcast %43 : vector<1x1x128xf32> to vector<2x128x128xf32>
    %45 = arith.mulf %19, %44 : vector<2x128x128xf32>
    %cst_18 = arith.constant dense<0.000000e+00> : vector<2x128xf32>
    %46 = vector.multi_reduction <add>, %45, %cst_18 [2] : vector<2x128x128xf32> to vector<2x128xf32>
    %47 = vector.shape_cast %46 : vector<2x128xf32> to vector<2x128x1xf32>
    %48 = tpu.concatenate %26, %33, %40, %47 in 2 : vector<2x128x1xf32>, vector<2x128x1xf32>, vector<2x128x1xf32>, vector<2x128x1xf32> -> vector<2x128x4xf32>
    %c0_19 = arith.constant 0 : index
    %c0_20 = arith.constant 0 : index
    %49 = memref.load %arg6[%c0_19, %c0_20] : memref<1x1xf32, #tpu.memory_space<smem>>
    %50 = vector.broadcast %49 : f32 to vector<2x128x4xf32>
    %51 = arith.addf %48, %50 : vector<2x128x4xf32>
    %c0_21 = arith.constant 0 : index
    %c0_22 = arith.constant 0 : index
    %c0_23 = arith.constant 0 : index
    %52 = vector.load %arg7[%c0_21, %c0_22, %c0_23] : memref<2x128x4xf32, #tpu.memory_space<vmem>>, vector<2x128x4xf32>
    tpu.vector_store %arg7[%c0_21, %c0_22, %c0_23], %51 {strides = array<i32>} : memref<2x128x4xf32, #tpu.memory_space<vmem>>, vector<2x128x4xf32>,
    return
  }
  func.func @transform_0(%arg0: i32) -> (i32, i32, i32) {
    %c0_i32 = arith.constant 0 : i32
    %c0_i32_0 = arith.constant 0 : i32
    %c0_i32_1 = arith.constant 0 : i32
    return %c0_i32, %arg0, %c0_i32_0 : i32, i32, i32
  }
  func.func @transform_1(%arg0: i32) -> (i32, i32) {
    %c0_i32 = arith.constant 0 : i32
    %c0_i32_0 = arith.constant 0 : i32
    %c0_i32_1 = arith.constant 0 : i32
    return %c0_i32, %c0_i32_0 : i32, i32
  }
  func.func @transform_2(%arg0: i32) -> (i32, i32) {
    %c0_i32 = arith.constant 0 : i32
    %c0_i32_0 = arith.constant 0 : i32
    %c0_i32_1 = arith.constant 0 : i32
    return %c0_i32, %c0_i32_0 : i32, i32
  }
  func.func @transform_3(%arg0: i32) -> (i32, i32) {
    %c0_i32 = arith.constant 0 : i32
    %c0_i32_0 = arith.constant 0 : i32
    %c0_i32_1 = arith.constant 0 : i32
    return %c0_i32, %c0_i32_0 : i32, i32
  }
  func.func @transform_4(%arg0: i32) -> (i32, i32) {
    %c0_i32 = arith.constant 0 : i32
    %c0_i32_0 = arith.constant 0 : i32
    %c0_i32_1 = arith.constant 0 : i32
    return %c0_i32, %c0_i32_0 : i32, i32
  }
  func.func @transform_5(%arg0: i32) -> (i32, i32) {
    %c0_i32 = arith.constant 0 : i32
    %c0_i32_0 = arith.constant 0 : i32
    %c0_i32_1 = arith.constant 0 : i32
    return %c0_i32, %c0_i32_0 : i32, i32
  }
  func.func @transform_6(%arg0: i32) -> (i32, i32, i32) {
    %c0_i32 = arith.constant 0 : i32
    %c0_i32_0 = arith.constant 0 : i32
    %c0_i32_1 = arith.constant 0 : i32
    return %c0_i32, %arg0, %c0_i32_0 : i32, i32, i32
  }
}

</mosaic_0001>

<bundles_post_ra>
// kernel: tpu_custom_call.1
= control target key start
LH: loop header
LB: loop body
LE: loop exit
PB: predicated region body
PF: predicated region fallthrough
CT: control target
= control target key end

     0   :  { %12 = vsyncpa [#allocation4], 0  ;;  %s2328_s0 = inlined_call_operand.hbm [shape: f32[3,128,128], index: 0, kind: input, shape index: {}]   ;;  %s2329_s1 = inlined_call_operand.hbm [shape: bf16[128,128], index: 1, kind: input, shape index: {}]   ;;  %s2330_s2 = inlined_call_operand.hbm [shape: bf16[128,128], index: 2, kind: input, shape index: {}]   ;;  %s2331_s3 = inlined_call_operand.vmem [shape: f32[1,128], index: 3, kind: input, shape index: {}]   ;;  %s2332_s4 = inlined_call_operand.vmem [shape: f32[4,128], index: 4, kind: input, shape index: {}]   ;;  %s2333_s5 = inlined_call_operand.<no memory space> [shape: f32[1,1], index: 5, kind: input, shape index: {}]   ;;  %s2334_s6 = inlined_call_operand.vmem [shape: f32[2,128,4], index: 6, kind: output, shape index: {}]  }
   0x1   :  { %13 = vsyncpa [#allocation6], 0  ;;  %s1405_s21 = smov [#allocation5]   ;;  %s1335_s25 = scalar_lea.hbm %s2329_s1, 1024 }
   0x2   :  { %s31_s22 = sshll.u32 %s1405_s21, 4  ;;  %p1336_p0 = scmp.ne.s32.totalorder %s2329_s1, %s1335_s25  ;;  %s32_s22 = int_to_ptr.vmem [resolvable:$true] %s31_s22 }
   0x3   :  { %p1339_p1 = scmp.lt.u32.totalorder %s1335_s25, %s2329_s1 }
   0x5   :  { %p1341_p2 = pnand %p1339_p1, %p1336_p0 }
   0x7   :  { %1344 = shalt.err (!%p1341_p2)
}
   0x8   :  { %s1345_s30 = scalar_lea.vmem %s32_s22, 1024  ;;  %p1350_p4 = scmp.lt.s32.totalorder %s32_s22, %s32_s22 }
   0x9   :  { %p1346_p3 = scmp.ne.s32.totalorder %s32_s22, %s1345_s30  ;;  %p1351_p5 = scmp.lt.s32.totalorder %s1345_s30, %s1345_s30 }
   0xb   :  { %p1352_p6 = por %p1351_p5, %p1350_p4 }
   0xd   :  { %p1353_p7 = pnand %p1352_p6, %p1346_p3 }
   0xf   :  { %1356 = shalt.err (!%p1353_p7)
}
  0x10   :  { %s1406_s7 = smov 64   ;;  %s1407_s8 = smov 4  }
  0x11   :  { %37 = dma.hbm_to_vmem [thread:$0]  %s2329_s1, 1024, %s32_s22, [#allocation6], %s1406_s7, %s1406_s7, %s1407_s8  }
  0x12   :  { %s1408_s11 = smov [#allocation3]   ;;  %s1357_s15 = scalar_lea.hbm %s2328_s0, 6144 }
  0x13   :  { %s19_s12 = sshll.u32 %s1408_s11, 4  ;;  %p1358_p8 = scmp.ne.s32.totalorder %s2328_s0, %s1357_s15  ;;  %s20_s12 = int_to_ptr.vmem [resolvable:$true] %s19_s12 }
  0x14   :  { %p1361_p9 = scmp.lt.u32.totalorder %s1357_s15, %s2328_s0 }
  0x16   :  { %p1363_p10 = pnand %p1361_p9, %p1358_p8 }
  0x18   :  { %1366 = shalt.err (!%p1363_p10)
}
  0x19   :  { %s1367_s20 = scalar_lea.vmem %s20_s12, 6144  ;;  %p1372_p12 = scmp.lt.s32.totalorder %s20_s12, %s20_s12 }
  0x1a   :  { %p1368_p11 = scmp.ne.s32.totalorder %s20_s12, %s1367_s20  ;;  %p1373_p13 = scmp.lt.s32.totalorder %s1367_s20, %s1367_s20 }
  0x1c   :  { %p1374_p0 = por %p1373_p13, %p1372_p12 }
  0x1e   :  { %p1375_p1 = pnand %p1374_p0, %p1368_p11 }
  0x20   :  { %1378 = shalt.err (!%p1375_p1)
}
  0x21   :  { %s1409_s1 = smov 128   ;;  %s1410_s21 = smov 8  }
  0x22   :  { %25 = dma.hbm_to_vmem [thread:$0]  %s2328_s0, 6144, %s20_s12, [#allocation4], %s1409_s1, %s1409_s1, %s1410_s21  }
  0x23   :  { %s1411_s24 = smov [#allocation7]   ;;  %s1379_s28 = scalar_lea.hbm %s2330_s2, 1024 }
  0x24   :  { %s43_s25 = sshll.u32 %s1411_s24, 4  ;;  %p1380_p2 = scmp.ne.s32.totalorder %s2330_s2, %s1379_s28  ;;  %s44_s25 = int_to_ptr.vmem [resolvable:$true] %s43_s25 }
  0x25   :  { %p1383_p3 = scmp.lt.u32.totalorder %s1379_s28, %s2330_s2 }
  0x27   :  { %p1385_p4 = pnand %p1383_p3, %p1380_p2 }
  0x29   :  { %1388 = shalt.err (!%p1385_p4)
}
  0x2a   :  { %s1389_s11 = scalar_lea.vmem %s44_s25, 1024  ;;  %p1394_p6 = scmp.lt.s32.totalorder %s44_s25, %s44_s25 }
  0x2b   :  { %p1390_p5 = scmp.ne.s32.totalorder %s44_s25, %s1389_s11  ;;  %p1395_p7 = scmp.lt.s32.totalorder %s1389_s11, %s1389_s11 }
  0x2d   :  { %p1396_p8 = por %p1395_p7, %p1394_p6 }
  0x2f   :  { %p1397_p9 = pnand %p1396_p8, %p1390_p5 }
  0x31   :  { %1400 = shalt.err (!%p1397_p9)
}
  0x32   :  { %49 = dma.hbm_to_vmem [thread:$0]  %s2330_s2, 1024, %s44_s25, [#allocation6], %s1406_s7, %s1406_s7, %s1407_s8  }
  0x33   :  { %1401 = dma.done.wait [#allocation4], 6144  }
  0x34   :  { %1402 = vsyncadd [#allocation4], 4294961152 }
  0x35   :  { %1403 = dma.done.wait [#allocation6], 2048  }
  0x36   :  { %1404 = vsyncadd [#allocation6], 4294965248  ;;  %v1319_v0 = vld [vmem:[#allocation7] sm:$0xff]   ;;  %v1321_v2 = vld [vmem:[#allocation7 + $0x8] sm:$0xff]   ;;  %vm999_vm0 = vcmask 7168   ;;  %vm1032_vm1 = vcmask 15360  }
  0x37   :  { %v1320_v1 = vld [vmem:[#allocation5] sm:$0xff]   ;;  %1232 = vmatprep.subr.bf16.mxu0 %v1319_v0  ;;  %v1322_v3 = vld [vmem:[#allocation5 + $0x8] sm:$0xff]   ;;  %v1323_v4 = vld [vmem:[#allocation7 + $0x10] sm:$0xff]   ;;  %vm1065_vm2 = vcmask 23552   ;;  %vm1132_vm3 = vcmask 31744  }
  0x38   :  { %1280 = vmatprep.subr.bf16.mxu1 %v1320_v1  ;;  %1233 = vmatpush3.bf16.msra.mxu0 %v1319_v0  ;;  %v1324_v5 = vld [vmem:[#allocation5 + $0x10] sm:$0xff]   ;;  %v1325_v6 = vld [vmem:[#allocation7 + $0x18] sm:$0xff]   ;;  %v1327_v8 = vld [vmem:[#allocation7 + $0x20] sm:$0xff]  }
  0x39   :  { %1281 = vmatpush3.bf16.msra.mxu1 %v1320_v1  ;;  %1234 = vmatprep.subr.bf16.mxu0 %v1321_v2  ;;  %v1326_v7 = vld [vmem:[#allocation5 + $0x18] sm:$0xff]   ;;  %v1328_v9 = vld [vmem:[#allocation5 + $0x20] sm:$0xff]   ;;  %v1329_v10 = vld [vmem:[#allocation7 + $0x28] sm:$0xff]  }
  0x3a   :  { %1282 = vmatprep.subr.bf16.mxu1 %v1322_v3  ;;  %v82_v11 = vld [vmem:[#allocation3 + $0x80] sm:$0xff]  ;;  %v83_v12 = vld [vmem:[#allocation3 + $0x88] sm:$0xff]  ;;  %v1331_v18 = vld [vmem:[#allocation7 + $0x30] sm:$0xff]  }
  0x3b   :  { %v66_v13 = vld [vmem:[#allocation3] sm:$0xff]  ;;  %v1330_v14 = vld [vmem:[#allocation5 + $0x28] sm:$0xff]   ;;  %v122_v15 = vpack.c.bf16 %v83_v12, %v82_v11  ;;  %v1332_v19 = vld [vmem:[#allocation5 + $0x30] sm:$0xff]  }
  0x3c   :  { %1235 = vmatpush3.bf16.msra.mxu0 %v1321_v2  ;;  %v67_v16 = vld [vmem:[#allocation3 + $0x8] sm:$0xff]  ;;  %v1333_v20 = vld [vmem:[#allocation7 + $0x38] sm:$0xff]   ;;  %v84_v22 = vld [vmem:[#allocation3 + $0x90] sm:$0xff] }
  0x3d   :  { %1283 = vmatpush3.bf16.msra.mxu1 %v1322_v3  ;;  %1236 = vmatprep.subr.bf16.mxu0 %v1323_v4  ;;  %v114_v17 = vpack.c.bf16 %v67_v16, %v66_v13  ;;  %v1334_v21 = vld [vmem:[#allocation5 + $0x38] sm:$0xff]   ;;  %v68_v24 = vld [vmem:[#allocation3 + $0x10] sm:$0xff]  ;;  %v86_v26 = vld [vmem:[#allocation3 + $0xa0] sm:$0xff] }
  0x3e   :  { %1284 = vmatprep.subr.bf16.mxu1 %v1324_v5  ;;  %1248 = vmatprep.mubr.bf16.mxu0 %v122_v15  ;;  %v85_v23 = vld [vmem:[#allocation3 + $0x98] sm:$0xff]  ;;  %v87_v27 = vld [vmem:[#allocation3 + $0xa8] sm:$0xff]  ;;  %v70_v28 = vld [vmem:[#allocation3 + $0x20] sm:$0xff] }
  0x3f   :  { %1296 = vmatprep.mubr.bf16.mxu1 %v114_v17  ;;  %v69_v25 = vld [vmem:[#allocation3 + $0x18] sm:$0xff]  ;;  %v71_v29 = vld [vmem:[#allocation3 + $0x28] sm:$0xff]  ;;  %v123_v30 = vpack.c.bf16 %v85_v23, %v84_v22  ;;  %v124_v32 = vpack.c.bf16 %v87_v27, %v86_v26  ;;  %v88_v34 = vld [vmem:[#allocation3 + $0xb0] sm:$0xff] }
  0x40   :  { %1237 = vmatpush3.bf16.msra.mxu0 %v1323_v4  ;;  %v115_v31 = vpack.c.bf16 %v69_v25, %v68_v24  ;;  %v116_v33 = vpack.c.bf16 %v71_v29, %v70_v28  ;;  %v89_v35 = vld [vmem:[#allocation3 + $0xb8] sm:$0xff]  ;;  %v90_v36 = vld [vmem:[#allocation3 + $0xc0] sm:$0xff]  ;;  %v91_v37 = vld [vmem:[#allocation3 + $0xc8] sm:$0xff] }
  0x41   :  { %1285 = vmatpush3.bf16.msra.mxu1 %v1324_v5  ;;  %1238 = vmatprep.subr.bf16.mxu0 %v1325_v6  ;;  %v72_v38 = vld [vmem:[#allocation3 + $0x30] sm:$0xff]  ;;  %v73_v39 = vld [vmem:[#allocation3 + $0x38] sm:$0xff]  ;;  %v74_v40 = vld [vmem:[#allocation3 + $0x40] sm:$0xff]  ;;  %v125_v42 = vpack.c.bf16 %v89_v35, %v88_v34  ;;  %v126_v43 = vpack.c.bf16 %v91_v37, %v90_v36 }
  0x42   :  { %1286 = vmatprep.subr.bf16.mxu1 %v1326_v7  ;;  %v75_v41 = vld [vmem:[#allocation3 + $0x48] sm:$0xff]  ;;  %v117_v44 = vpack.c.bf16 %v73_v39, %v72_v38  ;;  %v92_v46 = vld [vmem:[#allocation3 + $0xd0] sm:$0xff]  ;;  %v93_v47 = vld [vmem:[#allocation3 + $0xd8] sm:$0xff] }
  0x43   :  { %v118_v45 = vpack.c.bf16 %v75_v41, %v74_v40  ;;  %v94_v48 = vld [vmem:[#allocation3 + $0xe0] sm:$0xff]  ;;  %v95_v49 = vld [vmem:[#allocation3 + $0xe8] sm:$0xff]  ;;  %v76_v50 = vld [vmem:[#allocation3 + $0x50] sm:$0xff]  ;;  %v127_v54 = vpack.c.bf16 %v93_v47, %v92_v46 }
  0x44   :  { %1239 = vmatpush3.bf16.msra.mxu0 %v1325_v6  ;;  %v77_v51 = vld [vmem:[#allocation3 + $0x58] sm:$0xff]  ;;  %v78_v52 = vld [vmem:[#allocation3 + $0x60] sm:$0xff]  ;;  %v79_v53 = vld [vmem:[#allocation3 + $0x68] sm:$0xff]  ;;  %v128_v55 = vpack.c.bf16 %v95_v49, %v94_v48 }
  0x45   :  { %1287 = vmatpush3.bf16.msra.mxu1 %v1326_v7  ;;  %1240 = vmatprep.subr.bf16.mxu0 %v1327_v8  ;;  %v119_v56 = vpack.c.bf16 %v77_v51, %v76_v50  ;;  %v120_v57 = vpack.c.bf16 %v79_v53, %v78_v52  ;;  %v96_v58 = vld [vmem:[#allocation3 + $0xf0] sm:$0xff]  ;;  %v97_v59 = vld [vmem:[#allocation3 + $0xf8] sm:$0xff]  ;;  %v98_v60 = vld [vmem:[#allocation3 + $0x100] sm:$0xff] }
  0x46   :  { %1288 = vmatprep.subr.bf16.mxu1 %v1328_v9  ;;  %v99_v61 = vld [vmem:[#allocation3 + $0x108] sm:$0xff]  ;;  %v80_v62 = vld [vmem:[#allocation3 + $0x70] sm:$0xff]  ;;  %v81_v63 = vld [vmem:[#allocation3 + $0x78] sm:$0xff]  ;;  %v129_v0 = vpack.c.bf16 %v97_v59, %v96_v58 }
  0x47   :  { %v130_v1 = vpack.c.bf16 %v99_v61, %v98_v60  ;;  %v121_v2 = vpack.c.bf16 %v81_v63, %v80_v62  ;;  %v100_v3 = vld [vmem:[#allocation3 + $0x110] sm:$0xff]  ;;  %v101_v4 = vld [vmem:[#allocation3 + $0x118] sm:$0xff]  ;;  %v102_v5 = vld [vmem:[#allocation3 + $0x120] sm:$0xff] }
  0x48   :  { %1241 = vmatpush3.bf16.msra.mxu0 %v1327_v8  ;;  %v103_v6 = vld [vmem:[#allocation3 + $0x128] sm:$0xff]  ;;  %v131_v7 = vpack.c.bf16 %v101_v4, %v100_v3  ;;  %v106_v11 = vld [vmem:[#allocation3 + $0x140] sm:$0xff]  ;;  %v108_v15 = vld [vmem:[#allocation3 + $0x150] sm:$0xff] }
  0x49   :  { %1289 = vmatpush3.bf16.msra.mxu1 %v1328_v9  ;;  %1242 = vmatprep.subr.bf16.mxu0 %v1329_v10  ;;  %v132_v8 = vpack.c.bf16 %v103_v6, %v102_v5  ;;  %v104_v9 = vld [vmem:[#allocation3 + $0x130] sm:$0xff]  ;;  %v107_v12 = vld [vmem:[#allocation3 + $0x148] sm:$0xff]  ;;  %v109_v16 = vld [vmem:[#allocation3 + $0x158] sm:$0xff] }
  0x4a   :  { %1290 = vmatprep.subr.bf16.mxu1 %v1330_v14  ;;  %v110_v17 = vld [vmem:[#allocation3 + $0x160] sm:$0xff]  ;;  %v113_v22 = vld [vmem:[#allocation3 + $0x178] sm:$0xff] }
  0x4b   :  { %v1492_v24 = vld [vmem:[%s2331_s3] ss:$0 sm:$0xff]  ;;  %v1511_v39 = vld [vmem:[%s2332_s4 + $0x1] ss:$0 sm:$0xff]  ;;  %v1525_v48 = vld [vmem:[%s2332_s4 + $0x2] ss:$0 sm:$0xff] }
  0x4c   :  { %1243 = vmatpush3.bf16.msra.mxu0 %v1329_v10  ;;  %v105_v10 = vld [vmem:[#allocation3 + $0x138] sm:$0xff]  ;;  %v1516_v40 = vld [vmem:[%s2332_s4] ss:$0 sm:$0xff]  ;;  %v1541_v61 = vld [vmem:[%s2332_s4 + $0x3] ss:$0 sm:$0xff] }
  0x4d   :  { %1291 = vmatpush3.bf16.msra.mxu1 %v1330_v14  ;;  %1244 = vmatprep.subr.bf16.mxu0 %v1331_v18  ;;  %v133_v13 = vpack.c.bf16 %v105_v10, %v104_v9  ;;  %v134_v14 = vpack.c.bf16 %v107_v12, %v106_v11 }
  0x4e   :  { %1292 = vmatprep.subr.bf16.mxu1 %v1332_v19 }
  0x50   :  { %1245 = vmatpush3.bf16.msra.mxu0 %v1331_v18  ;;  %v111_v18 = vld [vmem:[#allocation3 + $0x168] sm:$0xff] }
  0x51   :  { %1293 = vmatpush3.bf16.msra.mxu1 %v1332_v19  ;;  %1246 = vmatprep.subr.bf16.mxu0 %v1333_v20  ;;  %v135_v19 = vpack.c.bf16 %v109_v16, %v108_v15 }
  0x52   :  { %1294 = vmatprep.subr.bf16.mxu1 %v1334_v21 }
  0x54   :  { %1247 = vmatpush3.bf16.msra.mxu0 %v1333_v20  ;;  %v136_v20 = vpack.c.bf16 %v111_v18, %v110_v17 }
  0x55   :  { %1295 = vmatpush3.bf16.msra.mxu1 %v1334_v21  ;;  %v112_v21 = vld [vmem:[#allocation3 + $0x170] sm:$0xff] }
  0x56   :  { %v137_v23 = vpack.c.bf16 %v113_v22, %v112_v21 }
  0x57   :  { %1249 = vmatmul.mubr.bf16.vlgmr.msra.gmra.mrb[0].mxu0 %v123_v30 }
  0x58   :  { %1297 = vmatmul.mubr.bf16.vlgmr.msra.gmra.mrb[0].mxu1 %v115_v31  ;;  %1252 = vmatprep.mubr.bf16.mxu0 %v124_v32 }
  0x59   :  { %1300 = vmatprep.mubr.bf16.mxu1 %v116_v33 }
  0x5f   :  { %1253 = vmatmul.mubr.bf16.gmra.mrb[4].mxu0 %v125_v42 }
  0x60   :  { %1256 = vmatprep.mubr.bf16.mxu0 %v126_v43  ;;  %1301 = vmatmul.mubr.bf16.gmra.mrb[4].mxu1 %v117_v44 }
  0x61   :  { %1304 = vmatprep.mubr.bf16.mxu1 %v118_v45 }
  0x67   :  { %1257 = vmatmul.mubr.bf16.gmra.mrb[8].mxu0 %v127_v54 }
  0x68   :  { %1260 = vmatprep.mubr.bf16.mxu0 %v128_v55  ;;  %1305 = vmatmul.mubr.bf16.gmra.mrb[8].mxu1 %v119_v56 }
  0x69   :  { %1308 = vmatprep.mubr.bf16.mxu1 %v120_v57 }
  0x6f   :  { %1261 = vmatmul.mubr.bf16.gmra.mrb[12].mxu0 %v129_v0 }
  0x70   :  { %1264 = vmatprep.mubr.bf16.mxu0 %v130_v1  ;;  %1309 = vmatmul.mubr.bf16.gmra.mrb[12].mxu1 %v121_v2 }
  0x77   :  { %1265 = vmatmul.mubr.bf16.gmra.mrb[16].mxu0 %v131_v7 }
  0x78   :  { %1268 = vmatprep.mubr.bf16.mxu0 %v132_v8 }
  0x7f   :  { %1269 = vmatmul.mubr.bf16.gmra.mrb[20].mxu0 %v133_v13 }
  0x80   :  { %1272 = vmatprep.mubr.bf16.mxu0 %v134_v14 }
  0x87   :  { %1273 = vmatmul.mubr.bf16.gmra.mrb[24].mxu0 %v135_v19 }
  0x88   :  { %1276 = vmatprep.mubr.bf16.mxu0 %v136_v20 }
  0x8f   :  { %1277 = vmatmul.mubr.bf16.gmra.mrb[28].mxu0 %v137_v23 }
 0x12a   :  { %v1250_v25 = vpop.f32.mrb[0].mxu0 }
 0x12b   :  { %v1298_v26 = vpop.f32.mrb[0].mxu1  ;;  %v252_v27 = vpop.f32.mrb[1].mxu0 }
 0x12c   :  { %v1495_v28 = vadd.f32 %v1298_v26, %v1492_v24  ;;  %v468_v29 = vpop.f32.mrb[1].mxu1  ;;  %v1251_v30 = vpop.f32.mrb[2].mxu0 }
 0x12d   :  { %v1498_v31 = vadd.f32 %v1492_v24, %v468_v29  ;;  %v1299_v32 = vpop.f32.mrb[2].mxu1  ;;  %v255_v33 = vpop.f32.mrb[3].mxu0 }
 0x12e   :  { %v533_v34 = vadd.f32 %v1250_v25, %v1495_v28  ;;  %v1502_v35 = vadd.f32 %v1299_v32, %v1492_v24  ;;  %v471_v36 = vpop.f32.mrb[3].mxu1 }
 0x12f   :  { %v531_v37 = vadd.f32 %v1498_v31, %v252_v27  ;;  %v1506_v38 = vadd.f32 %v1492_v24, %v471_v36 }
 0x130   :  { %v565_v41 = vmax.f32 %v533_v34, 0.0  ;;  %v534_v42 = vadd.f32 %v1251_v30, %v1502_v35 }
 0x131   :  { %v532_v43 = vadd.f32 %v1506_v38, %v255_v33  ;;  %v563_v1 = vmax.f32 %v531_v37, 0.0 }
 0x132   :  { %v566_v44 = vmax.f32 %v534_v42, 0.0  ;;  %v703_v45 = vmul.f32 %v1511_v39, %v565_v41  ;;  %v602_v46 = vmul.f32 %v1516_v40, %v565_v41  ;;  %v1254_v47 = vpop.f32.mrb[4].mxu0  ;;  %v804_v57 = vmul.f32 %v1525_v48, %v565_v41 }
 0x133   :  { %v268_v49 = vpop.f32.mrb[5].mxu0  ;;  %v1302_v50 = vpop.f32.mrb[4].mxu1  ;;  %v564_v3 = vmax.f32 %v532_v43, 0.0  ;;  %v905_v5 = vmul.f32 %v1541_v61, %v565_v41  ;;  %v600_v10 = vmul.f32 %v1516_v40, %v563_v1  ;;  %v701_v15 = vmul.f32 %v1511_v39, %v563_v1 }
 0x134   :  { %737 = vadd.xlane.f32.xlu0 %v703_v45  ;;  %636 = vadd.xlane.f32.xlu1 %v602_v46  ;;  %v1255_v51 = vpop.f32.mrb[6].mxu0  ;;  %v484_v52 = vpop.f32.mrb[5].mxu1  ;;  %v1528_v54 = vadd.f32 %v1302_v50, %v1492_v24  ;;  %v603_v58 = vmul.f32 %v1516_v40, %v566_v44  ;;  %v704_v6 = vmul.f32 %v1511_v39, %v566_v44 }
 0x135   :  { %v271_v53 = vpop.f32.mrb[7].mxu0  ;;  %v1531_v55 = vadd.f32 %v1492_v24, %v484_v52  ;;  %v1303_v56 = vpop.f32.mrb[6].mxu1  ;;  %v805_v13 = vmul.f32 %v1525_v48, %v566_v44  ;;  %v906_v14 = vmul.f32 %v1541_v61, %v566_v44  ;;  %v702_v17 = vmul.f32 %v1511_v39, %v564_v3 }
 0x136   :  { %v1536_v59 = vadd.f32 %v1303_v56, %v1492_v24  ;;  %v487_v60 = vpop.f32.mrb[7].mxu1  ;;  %v537_v62 = vadd.f32 %v1254_v47, %v1528_v54  ;;  %v802_v26 = vmul.f32 %v1525_v48, %v563_v1  ;;  %v1576_v27 = vmul.f32 %v1525_v48, %v564_v3 }
 0x137   :  { %v1545_v63 = vadd.f32 %v1531_v55, %v268_v49  ;;  %v1548_v0 = vadd.f32 %v1492_v24, %v487_v60  ;;  %v903_v34 = vmul.f32 %v1541_v61, %v563_v1  ;;  %v1586_v36 = vmul.f32 %v1541_v61, %v564_v3 }
 0x138   :  { %838 = vadd.xlane.f32.xlu0 %v804_v57  ;;  %638 = vadd.xlane.f32.xlu1 %v603_v58  ;;  %v538_v2 = vadd.f32 %v1255_v51, %v1536_v59  ;;  %v1561_v19 = vmax.f32 %v537_v62, 0.0  ;;  %v1589_v37 = vmul.f32 %v1516_v40, %v564_v3 }
 0x139   :  { %v1552_v4 = vadd.f32 %v1548_v0, %v271_v53 }
 0x13a   :  { %v1258_v7 = vpop.f32.mrb[8].mxu0  ;;  %v1572_v25 = vmax.f32 %v538_v2, 0.0  ;;  %v1594_v43 = vmul.f32 %v1516_v40, %v1561_v19  ;;  %v1602_v50 = vmul.f32 %v1511_v39, %v1561_v19  ;;  %v1606_v51 = vmul.f32 %v1525_v48, %v1561_v19 }
 0x13b   :  { %v284_v8 = vpop.f32.mrb[9].mxu0  ;;  %v1306_v9 = vpop.f32.mrb[8].mxu1 }
 0x13c   :  { %939 = vadd.xlane.f32.xlu0 %v905_v5  ;;  %739 = vadd.xlane.f32.xlu1 %v704_v6  ;;  %v1259_v11 = vpop.f32.mrb[10].mxu0  ;;  %v500_v12 = vpop.f32.mrb[9].mxu1  ;;  %v1564_v20 = vadd.f32 %v1306_v9, %v1492_v24  ;;  %v1598_v49 = vmul.f32 %v1516_v40, %v1572_v25 }
 0x13d   :  { %v287_v16 = vpop.f32.mrb[11].mxu0  ;;  %v1307_v18 = vpop.f32.mrb[10].mxu1  ;;  %v1567_v21 = vadd.f32 %v1492_v24, %v500_v12 }
 0x13e   :  { %v1570_v22 = vadd.f32 %v1307_v18, %v1492_v24  ;;  %v503_v23 = vpop.f32.mrb[11].mxu1  ;;  %v541_v30 = vadd.f32 %v1258_v7, %v1564_v20  ;;  %v1654_v18 = vmax.f32 %v1545_v63, 0.0 }
 0x13f   :  { %v1579_v29 = vadd.f32 %v1492_v24, %v503_v23  ;;  %v539_v32 = vadd.f32 %v1567_v21, %v284_v8 }
 0x140   :  { %840 = vadd.xlane.f32.xlu1 %v805_v13  ;;  %632 = vadd.xlane.f32.xlu0 %v600_v10  ;;  %v542_v33 = vadd.f32 %v1259_v11, %v1570_v22  ;;  %v573_v44 = vmax.f32 %v541_v30, 0.0 }
 0x141   :  { %v540_v41 = vadd.f32 %v1579_v29, %v287_v16  ;;  %v571_v45 = vmax.f32 %v539_v32, 0.0 }
 0x142   :  { %v1262_v42 = vpop.f32.mrb[12].mxu0  ;;  %v574_v46 = vmax.f32 %v542_v33, 0.0  ;;  %v1612_v58 = vmul.f32 %v1516_v40, %v573_v44  ;;  %v1618_v2 = vmul.f32 %v1511_v39, %v573_v44  ;;  %v1624_v5 = vmul.f32 %v1525_v48, %v573_v44 }
 0x143   :  { %v300_v47 = vpop.f32.mrb[13].mxu0  ;;  %v572_v52 = vmax.f32 %v540_v41, 0.0  ;;  %v1310_v53 = vpop.f32.mrb[12].mxu1  ;;  %v1630_v8 = vmul.f32 %v1541_v61, %v573_v44  ;;  %v1636_v10 = vmul.f32 %v1516_v40, %v571_v45  ;;  %v1651_v16 = vmul.f32 %v1511_v39, %v571_v45 }
 0x144   :  { %941 = vadd.xlane.f32.xlu1 %v906_v14  ;;  %733 = vadd.xlane.f32.xlu0 %v701_v15  ;;  %v1263_v56 = vpop.f32.mrb[14].mxu0  ;;  %v1609_v57 = vmul.f32 %v1516_v40, %v574_v46  ;;  %v1615_v60 = vmul.f32 %v1511_v39, %v574_v46  ;;  %v516_v62 = vpop.f32.mrb[13].mxu1  ;;  %v1621_v3 = vmul.f32 %v1525_v48, %v574_v46 }
 0x145   :  { %v303_v1 = vpop.f32.mrb[15].mxu0  ;;  %v1627_v6 = vmul.f32 %v1541_v61, %v574_v46  ;;  %v1311_v7 = vpop.f32.mrb[14].mxu1  ;;  %v1633_v9 = vmul.f32 %v1516_v40, %v572_v52  ;;  %v1639_v11 = vadd.f32 %v1310_v53, %v1492_v24  ;;  %v1642_v13 = vadd.f32 %v1492_v24, %v516_v62 }
 0x146   :  { %v519_v12 = vpop.f32.mrb[15].mxu1  ;;  %v1645_v14 = vadd.f32 %v1311_v7, %v1492_v24  ;;  %v1648_v15 = vmul.f32 %v1511_v39, %v572_v52  ;;  %v1661_v32 = vmul.f32 %v1525_v48, %v572_v52  ;;  %v1666_v44 = vmul.f32 %v1525_v48, %v571_v45 }
 0x147   :  { %v545_v23 = vadd.f32 %v1262_v42, %v1639_v11  ;;  %v1658_v30 = vadd.f32 %v1492_v24, %v519_v12  ;;  %v543_v33 = vadd.f32 %v1642_v13, %v300_v47  ;;  %v1669_v63 = vmul.f32 %v1541_v61, %v572_v52 }
 0x148   :  { %735 = vadd.xlane.f32.xlu1 %v702_v17  ;;  %834 = vadd.xlane.f32.xlu0 %v802_v26  ;;  %v546_v41 = vadd.f32 %v1263_v56, %v1645_v14  ;;  %v1673_v26 = vmul.f32 %v1511_v39, %v1572_v25  ;;  %v1677_v46 = vmul.f32 %v1541_v61, %v571_v45 }
 0x149   :  { %v577_v24 = vmax.f32 %v545_v23, 0.0  ;;  %v544_v42 = vadd.f32 %v1658_v30, %v303_v1  ;;  %v1682_v56 = vmul.f32 %v1525_v48, %v1572_v25  ;;  %v575_v52 = vmax.f32 %v543_v33, 0.0 }
 0x14a   :  { %v1266_v17 = vpop.f32.mrb[16].mxu0  ;;  %2335 = vst [vmem:[#allocation10_spill] sm:$0xff] %v1677_v46  ;;  %v578_v62 = vmax.f32 %v546_v41, 0.0 }
 0x14b   :  { %v549_v47 = vadd.f32 %v1266_v17, %v1495_v28  ;;  %v316_v53 = vpop.f32.mrb[17].mxu0  ;;  %v576_v23 = vmax.f32 %v544_v42, 0.0  ;;  %v1687_v1 = vmul.f32 %v1516_v40, %v577_v24  ;;  %v1690_v45 = vmul.f32 %v1511_v39, %v577_v24 }
 0x14c   :  { %v547_v7 = vadd.f32 %v1498_v31, %v316_v53  ;;  %836 = vadd.xlane.f32.xlu1 %v1576_v27  ;;  %935 = vadd.xlane.f32.xlu0 %v903_v34  ;;  %v1267_v12 = vpop.f32.mrb[18].mxu0  ;;  %v1694_v33 = vmul.f32 %v1516_v40, %v578_v62  ;;  %v1697_v31 = vmul.f32 %v1511_v39, %v578_v62 }
 0x14d   :  { %2336 = vst [vmem:[#allocation11_spill] sm:$0xff] %v1690_v45  ;;  %v581_v28 = vmax.f32 %v549_v47, 0.0  ;;  %v550_v17 = vadd.f32 %v1267_v12, %v1502_v35  ;;  %v319_v46 = vpop.f32.mrb[19].mxu0  ;;  %v1701_v41 = vmul.f32 %v1525_v48, %v578_v62  ;;  %v1704_v42 = vmul.f32 %v1525_v48, %v577_v24 }
 0x14e   :  { %v579_v27 = vmax.f32 %v547_v7, 0.0  ;;  %v548_v34 = vadd.f32 %v1506_v38, %v319_v46  ;;  %v1707_v47 = vmul.f32 %v1541_v61, %v578_v62  ;;  %v1710_v35 = vmul.f32 %v1541_v61, %v577_v24 }
 0x14f   :  { %v582_v53 = vmax.f32 %v550_v17, 0.0  ;;  %v1713_v12 = vmul.f32 %v1516_v40, %v576_v23  ;;  %v1718_v38 = vmul.f32 %v1516_v40, %v575_v52  ;;  %v1721_v46 = vmul.f32 %v1511_v39, %v576_v23 }
 0x150   :  { %v580_v45 = vmax.f32 %v548_v34, 0.0  ;;  %937 = vadd.xlane.f32.xlu1 %v1586_v36  ;;  %634 = vadd.xlane.f32.xlu0 %v1589_v37  ;;  %v1724_v62 = vmul.f32 %v1511_v39, %v575_v52  ;;  %v1727_v24 = vmul.f32 %v1525_v48, %v576_v23  ;;  %v1730_v7 = vmul.f32 %v1525_v48, %v575_v52 }
 0x151   :  { %2337 = vst [vmem:[#allocation12_spill] sm:$0xff] %v1721_v46  ;;  %v1733_v17 = vmul.f32 %v1541_v61, %v576_v23  ;;  %v1736_v36 = vmul.f32 %v1541_v61, %v575_v52  ;;  %v1739_v34 = vmul.f32 %v1516_v40, %v582_v53  ;;  %v1742_v46 = vmul.f32 %v1516_v40, %v581_v28 }
 0x152   :  { %2338 = vst [vmem:[#allocation13_spill] sm:$0xff] %v1724_v62  ;;  %2339 = vst [vmem:[#allocation14_spill] sm:$0xff] %v1727_v24  ;;  %v1270_v37 = vpop.f32.mrb[20].mxu0  ;;  %v1745_v62 = vmul.f32 %v1511_v39, %v582_v53  ;;  %v1748_v24 = vmul.f32 %v1511_v39, %v581_v28  ;;  %v1755_v52 = vmul.f32 %v1525_v48, %v581_v28 }
 0x153   :  { %2340 = vst [vmem:[#allocation15_spill] sm:$0xff] %v1730_v7  ;;  %2341 = vst [vmem:[#allocation16_spill] sm:$0xff] %v1733_v17  ;;  %v553_v7 = vadd.f32 %v1270_v37, %v1528_v54  ;;  %v332_v23 = vpop.f32.mrb[21].mxu0  ;;  %v1752_v17 = vmul.f32 %v1525_v48, %v582_v53  ;;  %v1767_v37 = vmul.f32 %v1541_v61, %v581_v28 }
 0x154   :  { %2342 = vst [vmem:[#allocation17_spill] sm:$0xff] %v1739_v34  ;;  %2343 = vst [vmem:[#allocation18_spill] sm:$0xff] %v1742_v46  ;;  %v1758_v34 = vmul.f32 %v1541_v61, %v582_v53  ;;  %v1761_v46 = vmax.f32 %v1552_v4, 0.0  ;;  %646 = vadd.xlane.f32.xlu1 %v1598_v49  ;;  %644 = vadd.xlane.f32.xlu0 %v1594_v43  ;;  %v1271_v54 = vpop.f32.mrb[22].mxu0  ;;  %v1774_v4 = vmul.f32 %v1516_v40, %v579_v27 }
 0x155   :  { %2344 = vst [vmem:[#allocation19_spill] sm:$0xff] %v1745_v62  ;;  %2345 = vst [vmem:[#allocation20_spill] sm:$0xff] %v1752_v17  ;;  %v551_v62 = vadd.f32 %v1531_v55, %v332_v23  ;;  %v1770_v17 = vmul.f32 %v1516_v40, %v580_v45  ;;  %v554_v53 = vadd.f32 %v1271_v54, %v1536_v59 }
 0x156   :  { %2346 = vst [vmem:[#allocation21_spill] sm:$0xff] %v1755_v52  ;;  %2347 = vst [vmem:[#allocation22_spill] sm:$0xff] %v1758_v34  ;;  %v585_v52 = vmax.f32 %v553_v7, 0.0  ;;  %v335_v34 = vpop.f32.mrb[23].mxu0  ;;  %v1777_v55 = vmul.f32 %v1511_v39, %v580_v45  ;;  %v1781_v23 = vmul.f32 %v1511_v39, %v579_v27  ;;  %v1784_v28 = vmul.f32 %v1525_v48, %v580_v45 }
 0x157   :  { %2348 = vst [vmem:[#allocation23_spill] sm:$0xff] %v1770_v17  ;;  %v583_v49 = vmax.f32 %v551_v62, 0.0  ;;  %v552_v43 = vadd.f32 %v1548_v0, %v335_v34  ;;  %v586_v17 = vmax.f32 %v554_v53, 0.0  ;;  %v1787_v7 = vmul.f32 %v1525_v48, %v579_v27 }
 0x158   :  { %2349 = vst [vmem:[#allocation24_spill] sm:$0xff] %v1777_v55  ;;  %v1790_v59 = vmul.f32 %v1541_v61, %v580_v45  ;;  %v1793_v54 = vmul.f32 %v1541_v61, %v579_v27  ;;  %747 = vadd.xlane.f32.xlu1 %v1673_v26  ;;  %745 = vadd.xlane.f32.xlu0 %v1602_v50 }
 0x159   :  { %v584_v55 = vmax.f32 %v552_v43, 0.0  ;;  %v1798_v0 = vmul.f32 %v1516_v40, %v585_v52  ;;  %v1801_v62 = vmul.f32 %v1511_v39, %v585_v52  ;;  %v1804_v34 = vmul.f32 %v1525_v48, %v585_v52 }
 0x15a   :  { %v1807_v45 = vmul.f32 %v1516_v40, %v586_v17  ;;  %v1810_v27 = vmul.f32 %v1511_v39, %v586_v17  ;;  %v1813_v53 = vmul.f32 %v1525_v48, %v586_v17  ;;  %v1816_v50 = vmul.f32 %v1541_v61, %v586_v17  ;;  %v1274_v26 = vpop.f32.mrb[24].mxu0 }
 0x15b   :  { %2350 = vst [vmem:[#allocation25_spill] sm:$0xff] %v1798_v0  ;;  %2351 = vst [vmem:[#allocation26_spill] sm:$0xff] %v1801_v62  ;;  %v1819_v43 = vmul.f32 %v1541_v61, %v585_v52  ;;  %v1822_v62 = vmul.f32 %v1516_v40, %v584_v55  ;;  %v1828_v0 = vmul.f32 %v1511_v39, %v584_v55 }
 0x15c   :  { %2352 = vst [vmem:[#allocation27_spill] sm:$0xff] %v1804_v34  ;;  %2353 = vst [vmem:[#allocation28_spill] sm:$0xff] %v1807_v45  ;;  %v1825_v34 = vmul.f32 %v1516_v40, %v583_v49  ;;  %v348_v45 = vpop.f32.mrb[25].mxu0  ;;  %v1835_v17 = vmul.f32 %v1525_v48, %v584_v55  ;;  %v1838_v52 = vmul.f32 %v1525_v48, %v583_v49  ;;  %848 = vadd.xlane.f32.xlu1 %v1682_v56 }
 0x15d   :  { %2354 = vst [vmem:[#allocation29_spill] sm:$0xff] %v1810_v27  ;;  %2355 = vst [vmem:[#allocation30_spill] sm:$0xff] %v1813_v53  ;;  %v557_v27 = vadd.f32 %v1274_v26, %v1564_v20  ;;  %v1832_v53 = vmul.f32 %v1511_v39, %v583_v49  ;;  %846 = vadd.xlane.f32.xlu0 %v1606_v51  ;;  %v1847_v20 = vmul.f32 %v1541_v61, %v583_v49 }
 0x15e   :  { %2356 = vst [vmem:[#allocation31_spill] sm:$0xff] %v1822_v62  ;;  %2357 = vst [vmem:[#allocation32_spill] sm:$0xff] %v1825_v34  ;;  %v555_v34 = vadd.f32 %v1567_v21, %v348_v45  ;;  %v1275_v62 = vpop.f32.mrb[26].mxu0  ;;  %v910_v26 = vmul.f32 %v1541_v61, %v1572_v25  ;;  %v605_v21 = vmul.f32 %v1516_v40, %v1761_v46 }
 0x15f   :  { %2358 = vst [vmem:[#allocation33_spill] sm:$0xff] %v1828_v0  ;;  %2359 = vst [vmem:[#allocation34_spill] sm:$0xff] %v1832_v53  ;;  %v1844_v0 = vmul.f32 %v1541_v61, %v584_v55  ;;  %v558_v56 = vadd.f32 %v1275_v62, %v1570_v22  ;;  %v351_v53 = vpop.f32.mrb[27].mxu0  ;;  %v604_v51 = vmul.f32 %v1516_v40, %v1654_v18 }
 0x160   :  { %2360 = vst [vmem:[#allocation35_spill] sm:$0xff] %v1835_v17  ;;  %2361 = vst [vmem:[#allocation36_spill] sm:$0xff] %v1838_v52  ;;  %v909_v17 = vmul.f32 %v1541_v61, %v1561_v19  ;;  %v589_v52 = vmax.f32 %v557_v27, 0.0  ;;  %v587_v55 = vmax.f32 %v555_v34, 0.0  ;;  %v556_v49 = vadd.f32 %v1579_v29, %v351_v53  ;;  %949 = vadd.xlane.f32.xlu1 %v910_v26 }
 0x161   :  { %2362 = vst [vmem:[#allocation37_spill] sm:$0xff] %v1847_v20  ;;  %v590_v45 = vmax.f32 %v558_v56, 0.0 }
 0x162   :  { %v1860_v20 = vmul.f32 %v1516_v40, %v589_v52  ;;  %v1863_v25 = vmul.f32 %v1511_v39, %v589_v52  ;;  %v1866_v19 = vmul.f32 %v1525_v48, %v589_v52  ;;  %947 = vadd.xlane.f32.xlu0 %v909_v17  ;;  %v588_v22 = vmax.f32 %v556_v49, 0.0 }
 0x163   :  { %v1869_v62 = vmul.f32 %v1541_v61, %v589_v52  ;;  %v1872_v34 = vmul.f32 %v1516_v40, %v587_v55  ;;  %v1875_v29 = vmul.f32 %v1511_v39, %v587_v55  ;;  %v1878_v27 = vmul.f32 %v1516_v40, %v590_v45  ;;  %v1278_v52 = vpop.f32.mrb[28].mxu0 }
 0x164   :  { %2363 = vst [vmem:[#allocation38_spill] sm:$0xff] %v1866_v19  ;;  %v1881_v53 = vmul.f32 %v1511_v39, %v590_v45  ;;  %v1884_v56 = vmul.f32 %v1525_v48, %v590_v45  ;;  %v1887_v17 = vmul.f32 %v1541_v61, %v590_v45  ;;  %v1890_v26 = vmul.f32 %v1516_v40, %v588_v22  ;;  %v364_v19 = vpop.f32.mrb[29].mxu0 }
 0x165   :  { %2364 = vst [vmem:[#allocation39_spill] sm:$0xff] %v1869_v62  ;;  %2365 = vst [vmem:[#allocation40_spill] sm:$0xff] %v1872_v34  ;;  %v1893_v49 = vmul.f32 %v1511_v39, %v588_v22  ;;  %v1899_v34 = vmul.f32 %v1525_v48, %v587_v55  ;;  %v561_v62 = vadd.f32 %v1278_v52, %v1639_v11  ;;  %642 = vadd.xlane.f32.xlu1 %v605_v21 }
 0x166   :  { %2366 = vst [vmem:[#allocation41_spill] sm:$0xff] %v1875_v29  ;;  %2367 = vst [vmem:[#allocation42_spill] sm:$0xff] %v1884_v56  ;;  %v1896_v29 = vmul.f32 %v1525_v48, %v588_v22  ;;  %v1903_v56 = vmul.f32 %v1541_v61, %v588_v22  ;;  %v1906_v45 = vmul.f32 %v1541_v61, %v587_v55  ;;  %640 = vadd.xlane.f32.xlu0 %v604_v51 }
 0x167   :  { %2368 = vst [vmem:[#allocation43_spill] sm:$0xff] %v1887_v17  ;;  %2369 = vst [vmem:[#allocation44_spill] sm:$0xff] %v1890_v26  ;;  %v559_v26 = vadd.f32 %v1642_v13, %v364_v19  ;;  %v593_v17 = vmax.f32 %v561_v62, 0.0  ;;  %v807_v22 = vmul.f32 %v1525_v48, %v1761_v46  ;;  %v806_v21 = vmul.f32 %v1525_v48, %v1654_v18 }
 0x168   :  { %2370 = vst [vmem:[#allocation45_spill] sm:$0xff] %v1893_v49  ;;  %2371 = vst [vmem:[#allocation46_spill] sm:$0xff] %v1896_v29  ;;  %v1279_v49 = vpop.f32.mrb[30].mxu0  ;;  %v706_v29 = vmul.f32 %v1511_v39, %v1761_v46 }
 0x169   :  { %2372 = vst [vmem:[#allocation47_spill] sm:$0xff] %v1899_v34  ;;  %2373 = vst [vmem:[#allocation48_spill] sm:$0xff] %v1906_v45  ;;  %v705_v34 = vmul.f32 %v1511_v39, %v1654_v18  ;;  %v562_v11 = vadd.f32 %v1279_v49, %v1645_v14  ;;  %v367_v52 = vpop.f32.mrb[31].mxu0  ;;  %v591_v51 = vmax.f32 %v559_v26, 0.0  ;;  %v1920_v19 = vmul.f32 %v1516_v40, %v593_v17 }
 0x16a   :  { %v560_v13 = vadd.f32 %v1658_v30, %v367_v52  ;;  %v1923_v45 = vmul.f32 %v1511_v39, %v593_v17  ;;  %v1926_v62 = vmul.f32 %v1525_v48, %v593_v17  ;;  %743 = vadd.xlane.f32.xlu1 %v706_v29 }
 0x16b   :  { %v594_v55 = vmax.f32 %v562_v11, 0.0  ;;  %741 = vadd.xlane.f32.xlu0 %v705_v34  ;;  %v1929_v49 = vmul.f32 %v1516_v40, %v591_v51  ;;  %v1932_v26 = vmul.f32 %v1511_v39, %v591_v51  ;;  %v1935_v30 = vmul.f32 %v1525_v48, %v591_v51 }
 0x16c   :  { %2374 = vst [vmem:[#allocation49_spill] sm:$0xff] %v1926_v62  ;;  %v592_v14 = vmax.f32 %v560_v13, 0.0  ;;  %v1947_v34 = vmul.f32 %v1541_v61, %v591_v51  ;;  %v2397_v51 = vld [vmem:[#allocation26_spill] sm:$0xff] }
 0x16d   :  { %2375 = vst [vmem:[#allocation50_spill] sm:$0xff] %v1929_v49  ;;  %2376 = vst [vmem:[#allocation51_spill] sm:$0xff] %v1932_v26  ;;  %v1938_v11 = vmul.f32 %v1516_v40, %v594_v55  ;;  %v1941_v52 = vmul.f32 %v1511_v39, %v594_v55  ;;  %v1944_v62 = vmul.f32 %v1525_v48, %v594_v55 }
 0x16e   :  { %2377 = vst [vmem:[#allocation52_spill] sm:$0xff] %v1935_v30  ;;  %v1950_v29 = vmul.f32 %v1516_v40, %v592_v14  ;;  %v1953_v13 = vmul.f32 %v1511_v39, %v592_v14  ;;  %v1956_v30 = vmul.f32 %v1525_v48, %v592_v14  ;;  %v1959_v26 = vmul.f32 %v1541_v61, %v592_v14  ;;  %v2379_v48 = vld [vmem:[#allocation10_spill] sm:$0xff] }
 0x16f   :  { %2378 = vst [vmem:[#allocation53_spill] sm:$0xff] %v1944_v62  ;;  %v1962_v49 = vmul.f32 %v1541_v61, %v594_v55  ;;  %v1965_v62 = vmul.f32 %v1541_v61, %v593_v17  ;;  %844 = vadd.xlane.f32.xlu1 %v807_v22  ;;  %842 = vadd.xlane.f32.xlu0 %v806_v21  ;;  %v2395_v17 = vld [vmem:[#allocation25_spill] sm:$0xff] }
 0x170   :  { %v908_v40 = vmul.f32 %v1541_v61, %v1761_v46  ;;  %v907_v39 = vmul.f32 %v1541_v61, %v1654_v18  ;;  %v2380_v61 = vld [vmem:[#allocation11_spill] sm:$0xff]  ;;  %v2396_v21 = vld [vmem:[#allocation29_spill] sm:$0xff] }
 0x173   :  { %945 = vadd.xlane.f32.xlu1 %v908_v40  ;;  %943 = vadd.xlane.f32.xlu0 %v907_v39 }
 0x177   :  { %654 = vadd.xlane.f32.xlu1 %v1609_v57  ;;  %652 = vadd.xlane.f32.xlu0 %v1612_v58  ;;  %v2381_v57 = vld [vmem:[#allocation12_spill] sm:$0xff]  ;;  %v2382_v58 = vld [vmem:[#allocation13_spill] sm:$0xff] }
 0x17b   :  { %755 = vadd.xlane.f32.xlu1 %v1615_v60  ;;  %753 = vadd.xlane.f32.xlu0 %v1618_v2  ;;  %v2383_v60 = vld [vmem:[#allocation14_spill] sm:$0xff]  ;;  %v2384_v2 = vld [vmem:[#allocation15_spill] sm:$0xff] }
 0x17f   :  { %856 = vadd.xlane.f32.xlu1 %v1621_v3  ;;  %854 = vadd.xlane.f32.xlu0 %v1624_v5  ;;  %v2385_v3 = vld [vmem:[#allocation16_spill] sm:$0xff]  ;;  %v2386_v5 = vld [vmem:[#allocation17_spill] sm:$0xff] }
 0x183   :  { %957 = vadd.xlane.f32.xlu1 %v1627_v6  ;;  %955 = vadd.xlane.f32.xlu0 %v1630_v8  ;;  %v2387_v6 = vld [vmem:[#allocation18_spill] sm:$0xff]  ;;  %v2388_v8 = vld [vmem:[#allocation19_spill] sm:$0xff] }
 0x187   :  { %650 = vadd.xlane.f32.xlu1 %v1633_v9  ;;  %648 = vadd.xlane.f32.xlu0 %v1636_v10  ;;  %v2389_v9 = vld [vmem:[#allocation20_spill] sm:$0xff]  ;;  %v2390_v10 = vld [vmem:[#allocation21_spill] sm:$0xff] }
 0x18b   :  { %751 = vadd.xlane.f32.xlu1 %v1648_v15  ;;  %749 = vadd.xlane.f32.xlu0 %v1651_v16  ;;  %v2391_v15 = vld [vmem:[#allocation22_spill] sm:$0xff] }
 0x18f   :  { %852 = vadd.xlane.f32.xlu1 %v1661_v32  ;;  %850 = vadd.xlane.f32.xlu0 %v1666_v44  ;;  %v2392_v32 = vld [vmem:[#allocation23_spill] sm:$0xff] }
 0x193   :  { %953 = vadd.xlane.f32.xlu1 %v1669_v63  ;;  %951 = vadd.xlane.f32.xlu0 %v2379_v48 }
 0x197   :  { %662 = vadd.xlane.f32.xlu1 %v1694_v33  ;;  %660 = vadd.xlane.f32.xlu0 %v1687_v1  ;;  %v2393_v33 = vld [vmem:[#allocation24_spill] sm:$0xff] }
 0x19b   :  { %763 = vadd.xlane.f32.xlu1 %v1697_v31  ;;  %761 = vadd.xlane.f32.xlu0 %v2380_v61  ;;  %v2019_v31 = vstv %s2333_s5  ;;  %v2398_v61 = vld [vmem:[#allocation30_spill] sm:$0xff] }
 0x19f   :  { %864 = vadd.xlane.f32.xlu1 %v1701_v41  ;;  %862 = vadd.xlane.f32.xlu0 %v1704_v42 }
 0x1a3   :  { %965 = vadd.xlane.f32.xlu1 %v1707_v47  ;;  %963 = vadd.xlane.f32.xlu0 %v1710_v35 }
 0x1a7   :  { %658 = vadd.xlane.f32.xlu1 %v1713_v12  ;;  %656 = vadd.xlane.f32.xlu0 %v1718_v38 }
 0x1ab   :  { %759 = vadd.xlane.f32.xlu1 %v2381_v57  ;;  %757 = vadd.xlane.f32.xlu0 %v2382_v58  ;;  %v2399_v57 = vld [vmem:[#allocation27_spill] sm:$0xff] }
 0x1af   :  { %860 = vadd.xlane.f32.xlu1 %v2383_v60  ;;  %858 = vadd.xlane.f32.xlu0 %v2384_v2 }
 0x1b3   :  { %961 = vadd.xlane.f32.xlu1 %v2385_v3  ;;  %959 = vadd.xlane.f32.xlu0 %v1736_v36 }
 0x1b7   :  { %670 = vadd.xlane.f32.xlu1 %v2386_v5  ;;  %668 = vadd.xlane.f32.xlu0 %v2387_v6 }
 0x1bb   :  { %771 = vadd.xlane.f32.xlu1 %v2388_v8  ;;  %769 = vadd.xlane.f32.xlu0 %v1748_v24 }
 0x1bf   :  { %872 = vadd.xlane.f32.xlu1 %v2389_v9  ;;  %870 = vadd.xlane.f32.xlu0 %v2390_v10  ;;  %v2400_v10 = vld [vmem:[#allocation31_spill] sm:$0xff] }
 0x1c1   :  { %v738_v16 = vpop.xlane.xlu0 %737  ;;  %v637_v18 = vpop.xlane.xlu1 %636 }
 0x1c2   :  { %v1002_v1 = vsel %vm999_vm0, %v637_v18, %v738_v16 }
 0x1c3   :  { %973 = vadd.xlane.f32.xlu1 %v2391_v15  ;;  %971 = vadd.xlane.f32.xlu0 %v1767_v37  ;;  %v2401_v15 = vld [vmem:[#allocation32_spill] sm:$0xff] }
 0x1c5   :  { %v839_v44 = vpop.xlane.xlu0 %838  ;;  %v639_v63 = vpop.xlane.xlu1 %638 }
 0x1c6   :  { %v1035_v41 = vsel %vm1032_vm1, %v1002_v1, %v839_v44 }
 0x1c7   :  { %666 = vadd.xlane.f32.xlu1 %v2392_v32  ;;  %664 = vadd.xlane.f32.xlu0 %v1774_v4  ;;  %v2402_v32 = vld [vmem:[#allocation33_spill] sm:$0xff] }
 0x1c9   :  { %v940_v42 = vpop.xlane.xlu0 %939  ;;  %v740_v47 = vpop.xlane.xlu1 %739 }
 0x1ca   :  { %v1068_v35 = vsel %vm1065_vm2, %v1035_v41, %v940_v42  ;;  %v1003_v24 = vsel %vm999_vm0, %v639_v63, %v740_v47  ;;  %v2405_v41 = vld [vmem:[#allocation36_spill] sm:$0xff] }
 0x1cb   :  { %767 = vadd.xlane.f32.xlu1 %v2393_v33  ;;  %765 = vadd.xlane.f32.xlu0 %v1781_v23  ;;  %v1102_v12 = vadd.f32 %v2019_v31, %v1068_v35  ;;  %v2404_v33 = vld [vmem:[#allocation35_spill] sm:$0xff] }
 0x1cd   :  { %1135 = vst.msk [vmem:[%s2334_s6 + $0x10] sm:$0xff] %vm1132_vm3, %v1102_v12  ;;  %v841_v38 = vpop.xlane.xlu1 %840  ;;  %v633_v46 = vpop.xlane.xlu0 %632 }
 0x1ce   :  { %v1036_v36 = vsel %vm1032_vm1, %v1003_v24, %v841_v38 }
 0x1cf   :  { %868 = vadd.xlane.f32.xlu1 %v1784_v28  ;;  %866 = vadd.xlane.f32.xlu0 %v1787_v7  ;;  %v2394_v7 = vld [vmem:[#allocation28_spill] sm:$0xff] }
 0x1d1   :  { %v942_v37 = vpop.xlane.xlu1 %941  ;;  %v734_v4 = vpop.xlane.xlu0 %733 }
 0x1d2   :  { %v1069_v23 = vsel %vm1065_vm2, %v1036_v36, %v942_v37  ;;  %v2406_v37 = vld [vmem:[#allocation37_spill] sm:$0xff] }
 0x1d3   :  { %969 = vadd.xlane.f32.xlu1 %v1790_v59  ;;  %967 = vadd.xlane.f32.xlu0 %v1793_v54  ;;  %v1103_v28 = vadd.f32 %v2019_v31, %v1069_v23  ;;  %v1000_v54 = vsel %vm999_vm0, %v633_v46, %v734_v4 }
 0x1d5   :  { %1136 = vst.msk [vmem:[%s2334_s6 + $0x18] sm:$0xff] %vm1132_vm3, %v1103_v28  ;;  %v736_v59 = vpop.xlane.xlu1 %735  ;;  %v835_v22 = vpop.xlane.xlu0 %834 }
 0x1d6   :  { %v1033_v55 = vsel %vm1032_vm1, %v1000_v54, %v835_v22  ;;  %v2407_v54 = vld [vmem:[#allocation42_spill] sm:$0xff] }
 0x1d7   :  { %678 = vadd.xlane.f32.xlu1 %v2394_v7  ;;  %676 = vadd.xlane.f32.xlu0 %v2395_v17 }
 0x1d9   :  { %v837_v14 = vpop.xlane.xlu1 %836  ;;  %v936_v40 = vpop.xlane.xlu0 %935 }
 0x1da   :  { %v1066_v39 = vsel %vm1065_vm2, %v1033_v55, %v936_v40 }
 0x1db   :  { %779 = vadd.xlane.f32.xlu1 %v2396_v21  ;;  %777 = vadd.xlane.f32.xlu0 %v2397_v51  ;;  %v1100_v48 = vadd.f32 %v2019_v31, %v1066_v39  ;;  %v2408_v21 = vld [vmem:[#allocation38_spill] sm:$0xff]  ;;  %v2409_v39 = vld [vmem:[#allocation43_spill] sm:$0xff] }
 0x1dd   :  { %1133 = vst.msk [vmem:[%s2334_s6] sm:$0xff] %vm1132_vm3, %v1100_v48  ;;  %v938_v58 = vpop.xlane.xlu1 %937  ;;  %v635_v60 = vpop.xlane.xlu0 %634  ;;  %v2410_v48 = vld [vmem:[#allocation39_spill] sm:$0xff] }
 0x1de   :  { %v1001_v2 = vsel %vm999_vm0, %v635_v60, %v736_v59  ;;  %v2412_v60 = vld [vmem:[#allocation40_spill] sm:$0xff] }
 0x1df   :  { %880 = vadd.xlane.f32.xlu1 %v2398_v61  ;;  %878 = vadd.xlane.f32.xlu0 %v2399_v57  ;;  %v1034_v3 = vsel %vm1032_vm1, %v1001_v2, %v837_v14 }
 0x1e0   :  { %v1067_v5 = vsel %vm1065_vm2, %v1034_v3, %v938_v58  ;;  %v2411_v58 = vld [vmem:[#allocation44_spill] sm:$0xff] }
 0x1e1   :  { %v1101_v6 = vadd.f32 %v2019_v31, %v1067_v5  ;;  %v647_v8 = vpop.xlane.xlu1 %646  ;;  %v645_v9 = vpop.xlane.xlu0 %644  ;;  %v2413_v5 = vld [vmem:[#allocation45_spill] sm:$0xff] }
 0x1e3   :  { %981 = vadd.xlane.f32.xlu1 %v1816_v50  ;;  %979 = vadd.xlane.f32.xlu0 %v1819_v43  ;;  %1134 = vst.msk [vmem:[%s2334_s6 + $0x8] sm:$0xff] %vm1132_vm3, %v1101_v6  ;;  %v2403_v50 = vld [vmem:[#allocation34_spill] sm:$0xff]  ;;  %v2414_v6 = vld [vmem:[#allocation41_spill] sm:$0xff] }
 0x1e5   :  { %v748_v16 = vpop.xlane.xlu1 %747  ;;  %v746_v18 = vpop.xlane.xlu0 %745 }
 0x1e6   :  { %v1007_v63 = vsel %vm999_vm0, %v647_v8, %v748_v16  ;;  %v1006_v1 = vsel %vm999_vm0, %v645_v9, %v746_v18  ;;  %v2415_v16 = vld [vmem:[#allocation46_spill] sm:$0xff]  ;;  %v2416_v18 = vld [vmem:[#allocation47_spill] sm:$0xff] }
 0x1e7   :  { %674 = vadd.xlane.f32.xlu1 %v2400_v10  ;;  %672 = vadd.xlane.f32.xlu0 %v2401_v15 }
 0x1e9   :  { %v849_v43 = vpop.xlane.xlu1 %848 }
 0x1ea   :  { %v847_v44 = vpop.xlane.xlu0 %846  ;;  %v1040_v42 = vsel %vm1032_vm1, %v1007_v63, %v849_v43 }
 0x1eb   :  { %775 = vadd.xlane.f32.xlu1 %v2402_v32  ;;  %773 = vadd.xlane.f32.xlu0 %v2403_v50  ;;  %v1039_v47 = vsel %vm1032_vm1, %v1006_v1, %v847_v44 }
 0x1ed   :  { %v950_v35 = vpop.xlane.xlu1 %949 }
 0x1ee   :  { %v1073_v38 = vsel %vm1065_vm2, %v1040_v42, %v950_v35  ;;  %v2417_v42 = vld [vmem:[#allocation48_spill] sm:$0xff] }
 0x1ef   :  { %876 = vadd.xlane.f32.xlu1 %v2404_v33  ;;  %874 = vadd.xlane.f32.xlu0 %v2405_v41  ;;  %v948_v12 = vpop.xlane.xlu0 %947  ;;  %v1107_v24 = vadd.f32 %v2019_v31, %v1073_v38 }
 0x1f0   :  { %v1072_v46 = vsel %vm1065_vm2, %v1039_v47, %v948_v12 }
 0x1f1   :  { %v1106_v36 = vadd.f32 %v2019_v31, %v1072_v46  ;;  %1140 = vst.msk [vmem:[%s2334_s6 + $0x38] sm:$0xff] %vm1132_vm3, %v1107_v24 }
 0x1f2   :  { %v643_v4 = vpop.xlane.xlu1 %642 }
 0x1f3   :  { %977 = vadd.xlane.f32.xlu1 %v1844_v0  ;;  %975 = vadd.xlane.f32.xlu0 %v2406_v37  ;;  %1139 = vst.msk [vmem:[%s2334_s6 + $0x30] sm:$0xff] %vm1132_vm3, %v1106_v36  ;;  %v641_v23 = vpop.xlane.xlu0 %640  ;;  %v2418_v37 = vld [vmem:[#allocation53_spill] sm:$0xff] }
 0x1f7   :  { %686 = vadd.xlane.f32.xlu1 %v1878_v27  ;;  %684 = vadd.xlane.f32.xlu0 %v1860_v20  ;;  %v744_v28 = vpop.xlane.xlu1 %743 }
 0x1f8   :  { %v742_v0 = vpop.xlane.xlu0 %741  ;;  %v1005_v59 = vsel %vm999_vm0, %v643_v4, %v744_v28  ;;  %v2419_v4 = vld [vmem:[#allocation49_spill] sm:$0xff] }
 0x1f9   :  { %v1004_v22 = vsel %vm999_vm0, %v641_v23, %v742_v0 }
 0x1fb   :  { %787 = vadd.xlane.f32.xlu1 %v1881_v53  ;;  %785 = vadd.xlane.f32.xlu0 %v1863_v25 }
 0x1fc   :  { %v845_v7 = vpop.xlane.xlu1 %844  ;;  %v843_v17 = vpop.xlane.xlu0 %842 }
 0x1fd   :  { %v1038_v27 = vsel %vm1032_vm1, %v1005_v59, %v845_v7  ;;  %v1037_v20 = vsel %vm1032_vm1, %v1004_v22, %v843_v17  ;;  %v2420_v17 = vld [vmem:[#allocation50_spill] sm:$0xff] }
 0x1ff   :  { %888 = vadd.xlane.f32.xlu1 %v2407_v54  ;;  %886 = vadd.xlane.f32.xlu0 %v2408_v21  ;;  %v2421_v54 = vld [vmem:[#allocation51_spill] sm:$0xff] }
 0x200   :  { %v946_v51 = vpop.xlane.xlu1 %945  ;;  %v944_v55 = vpop.xlane.xlu0 %943 }
 0x201   :  { %v1071_v53 = vsel %vm1065_vm2, %v1038_v27, %v946_v51  ;;  %v1070_v25 = vsel %vm1065_vm2, %v1037_v20, %v944_v55  ;;  %v2422_v27 = vld [vmem:[#allocation52_spill] sm:$0xff] }
 0x202   :  { %v1105_v14 = vadd.f32 %v2019_v31, %v1071_v53  ;;  %v1104_v40 = vadd.f32 %v2019_v31, %v1070_v25 }
 0x203   :  { %989 = vadd.xlane.f32.xlu1 %v2409_v39  ;;  %987 = vadd.xlane.f32.xlu0 %v2410_v48 }
 0x204   :  { %1138 = vst.msk [vmem:[%s2334_s6 + $0x28] sm:$0xff] %vm1132_vm3, %v1105_v14  ;;  %1137 = vst.msk [vmem:[%s2334_s6 + $0x20] sm:$0xff] %vm1132_vm3, %v1104_v40  ;;  %v655_v61 = vpop.xlane.xlu1 %654  ;;  %v653_v57 = vpop.xlane.xlu0 %652 }
 0x207   :  { %682 = vadd.xlane.f32.xlu1 %v2411_v58  ;;  %680 = vadd.xlane.f32.xlu0 %v2412_v60 }
 0x208   :  { %v756_v2 = vpop.xlane.xlu1 %755  ;;  %v754_v3 = vpop.xlane.xlu0 %753 }
 0x209   :  { %v1011_v10 = vsel %vm999_vm0, %v655_v61, %v756_v2  ;;  %v1010_v15 = vsel %vm999_vm0, %v653_v57, %v754_v3 }
 0x20b   :  { %783 = vadd.xlane.f32.xlu1 %v2413_v5  ;;  %781 = vadd.xlane.f32.xlu0 %v2414_v6 }
 0x20c   :  { %v857_v8 = vpop.xlane.xlu1 %856  ;;  %v855_v9 = vpop.xlane.xlu0 %854 }
 0x20d   :  { %v1044_v32 = vsel %vm1032_vm1, %v1011_v10, %v857_v8  ;;  %v1043_v50 = vsel %vm1032_vm1, %v1010_v15, %v855_v9 }
 0x20f   :  { %884 = vadd.xlane.f32.xlu1 %v2415_v16  ;;  %882 = vadd.xlane.f32.xlu0 %v2416_v18 }
 0x210   :  { %v958_v43 = vpop.xlane.xlu1 %957  ;;  %v956_v44 = vpop.xlane.xlu0 %955 }
 0x211   :  { %v1077_v63 = vsel %vm1065_vm2, %v1044_v32, %v958_v43  ;;  %v1076_v1 = vsel %vm1065_vm2, %v1043_v50, %v956_v44 }
 0x212   :  { %v1111_v33 = vadd.f32 %v2019_v31, %v1077_v63  ;;  %v1110_v41 = vadd.f32 %v2019_v31, %v1076_v1 }
 0x213   :  { %985 = vadd.xlane.f32.xlu1 %v1903_v56  ;;  %983 = vadd.xlane.f32.xlu0 %v2417_v42 }
 0x214   :  { %1144 = vst.msk [vmem:[%s2334_s6 + $0x58] sm:$0xff] %vm1132_vm3, %v1111_v33  ;;  %1143 = vst.msk [vmem:[%s2334_s6 + $0x50] sm:$0xff] %vm1132_vm3, %v1110_v41  ;;  %v651_v47 = vpop.xlane.xlu1 %650  ;;  %v649_v35 = vpop.xlane.xlu0 %648 }
 0x217   :  { %694 = vadd.xlane.f32.xlu1 %v1938_v11  ;;  %692 = vadd.xlane.f32.xlu0 %v1920_v19 }
 0x218   :  { %v752_v12 = vpop.xlane.xlu1 %751  ;;  %v750_v56 = vpop.xlane.xlu0 %749 }
 0x219   :  { %v1009_v24 = vsel %vm999_vm0, %v651_v47, %v752_v12  ;;  %v1008_v36 = vsel %vm999_vm0, %v649_v35, %v750_v56 }
 0x21b   :  { %795 = vadd.xlane.f32.xlu1 %v1941_v52  ;;  %793 = vadd.xlane.f32.xlu0 %v1923_v45 }
 0x21c   :  { %v853_v38 = vpop.xlane.xlu1 %852  ;;  %v851_v46 = vpop.xlane.xlu0 %850 }
 0x21d   :  { %v1042_v11 = vsel %vm1032_vm1, %v1009_v24, %v853_v38  ;;  %v1041_v19 = vsel %vm1032_vm1, %v1008_v36, %v851_v46 }
 0x21f   :  { %896 = vadd.xlane.f32.xlu1 %v2418_v37  ;;  %894 = vadd.xlane.f32.xlu0 %v2419_v4 }
 0x220   :  { %v954_v23 = vpop.xlane.xlu1 %953  ;;  %v952_v28 = vpop.xlane.xlu0 %951 }
 0x221   :  { %v1075_v52 = vsel %vm1065_vm2, %v1042_v11, %v954_v23  ;;  %v1074_v45 = vsel %vm1065_vm2, %v1041_v19, %v952_v28 }
 0x222   :  { %v1109_v0 = vadd.f32 %v2019_v31, %v1075_v52  ;;  %v1108_v7 = vadd.f32 %v2019_v31, %v1074_v45 }
 0x223   :  { %690 = vadd.xlane.f32.xlu1 %v1950_v29  ;;  %688 = vadd.xlane.f32.xlu0 %v2420_v17 }
 0x224   :  { %1142 = vst.msk [vmem:[%s2334_s6 + $0x48] sm:$0xff] %vm1132_vm3, %v1109_v0  ;;  %1141 = vst.msk [vmem:[%s2334_s6 + $0x40] sm:$0xff] %vm1132_vm3, %v1108_v7  ;;  %v663_v59 = vpop.xlane.xlu1 %662  ;;  %v661_v22 = vpop.xlane.xlu0 %660 }
 0x227   :  { %791 = vadd.xlane.f32.xlu1 %v1953_v13  ;;  %789 = vadd.xlane.f32.xlu0 %v2421_v54 }
 0x228   :  { %v764_v21 = vpop.xlane.xlu1 %763  ;;  %v762_v29 = vpop.xlane.xlu0 %761 }
 0x229   :  { %v1015_v55 = vsel %vm999_vm0, %v663_v59, %v764_v21  ;;  %v1014_v53 = vsel %vm999_vm0, %v661_v22, %v762_v29 }
 0x22b   :  { %892 = vadd.xlane.f32.xlu1 %v1956_v30  ;;  %890 = vadd.xlane.f32.xlu0 %v2422_v27 }
 0x22c   :  { %v865_v20 = vpop.xlane.xlu1 %864  ;;  %v863_v51 = vpop.xlane.xlu0 %862 }
 0x22d   :  { %v1048_v13 = vsel %vm1032_vm1, %v1015_v55, %v865_v20  ;;  %v1047_v25 = vsel %vm1032_vm1, %v1014_v53, %v863_v51 }
 0x22f   :  { %993 = vadd.xlane.f32.xlu1 %v1959_v26  ;;  %991 = vadd.xlane.f32.xlu0 %v1947_v34 }
 0x230   :  { %v966_v14 = vpop.xlane.xlu1 %965  ;;  %v964_v40 = vpop.xlane.xlu0 %963 }
 0x231   :  { %v1081_v30 = vsel %vm1065_vm2, %v1048_v13, %v966_v14  ;;  %v1080_v39 = vsel %vm1065_vm2, %v1047_v25, %v964_v40 }
 0x232   :  { %v1115_v48 = vadd.f32 %v2019_v31, %v1081_v30  ;;  %v1114_v61 = vadd.f32 %v2019_v31, %v1080_v39 }
 0x233   :  { %997 = vadd.xlane.f32.xlu1 %v1962_v49  ;;  %995 = vadd.xlane.f32.xlu0 %v1965_v62 }
 0x234   :  { %1148 = vst.msk [vmem:[%s2334_s6 + $0x78] sm:$0xff] %vm1132_vm3, %v1115_v48  ;;  %1147 = vst.msk [vmem:[%s2334_s6 + $0x70] sm:$0xff] %vm1132_vm3, %v1114_v61  ;;  %v659_v26 = vpop.xlane.xlu1 %658  ;;  %v657_v34 = vpop.xlane.xlu0 %656 }
 0x238   :  { %v760_v57 = vpop.xlane.xlu1 %759  ;;  %v758_v58 = vpop.xlane.xlu0 %757 }
 0x239   :  { %v1013_v49 = vsel %vm999_vm0, %v659_v26, %v760_v57  ;;  %v1012_v62 = vsel %vm999_vm0, %v657_v34, %v758_v58 }
 0x23c   :  { %v861_v60 = vpop.xlane.xlu1 %860  ;;  %v859_v2 = vpop.xlane.xlu0 %858 }
 0x23d   :  { %v1046_v3 = vsel %vm1032_vm1, %v1013_v49, %v861_v60  ;;  %v1045_v5 = vsel %vm1032_vm1, %v1012_v62, %v859_v2 }
 0x240   :  { %v962_v6 = vpop.xlane.xlu1 %961  ;;  %v960_v8 = vpop.xlane.xlu0 %959 }
 0x241   :  { %v1079_v9 = vsel %vm1065_vm2, %v1046_v3, %v962_v6  ;;  %v1078_v10 = vsel %vm1065_vm2, %v1045_v5, %v960_v8 }
 0x242   :  { %v1113_v15 = vadd.f32 %v2019_v31, %v1079_v9  ;;  %v1112_v16 = vadd.f32 %v2019_v31, %v1078_v10 }
 0x244   :  { %1146 = vst.msk [vmem:[%s2334_s6 + $0x68] sm:$0xff] %vm1132_vm3, %v1113_v15  ;;  %1145 = vst.msk [vmem:[%s2334_s6 + $0x60] sm:$0xff] %vm1132_vm3, %v1112_v16  ;;  %v671_v18 = vpop.xlane.xlu1 %670  ;;  %v669_v32 = vpop.xlane.xlu0 %668 }
 0x248   :  { %v772_v50 = vpop.xlane.xlu1 %771  ;;  %v770_v43 = vpop.xlane.xlu0 %769 }
 0x249   :  { %v1019_v1 = vsel %vm999_vm0, %v671_v18, %v772_v50  ;;  %v1018_v33 = vsel %vm999_vm0, %v669_v32, %v770_v43 }
 0x24c   :  { %v873_v44 = vpop.xlane.xlu1 %872  ;;  %v871_v63 = vpop.xlane.xlu0 %870 }
 0x24d   :  { %v1052_v41 = vsel %vm1032_vm1, %v1019_v1, %v873_v44  ;;  %v1051_v42 = vsel %vm1032_vm1, %v1018_v33, %v871_v63 }
 0x250   :  { %v974_v47 = vpop.xlane.xlu1 %973  ;;  %v972_v35 = vpop.xlane.xlu0 %971 }
 0x251   :  { %v1085_v12 = vsel %vm1065_vm2, %v1052_v41, %v974_v47  ;;  %v1084_v56 = vsel %vm1065_vm2, %v1051_v42, %v972_v35 }
 0x252   :  { %v1119_v38 = vadd.f32 %v2019_v31, %v1085_v12  ;;  %v1118_v46 = vadd.f32 %v2019_v31, %v1084_v56 }
 0x254   :  { %1152 = vst.msk [vmem:[%s2334_s6 + $0x98] sm:$0xff] %vm1132_vm3, %v1119_v38  ;;  %1151 = vst.msk [vmem:[%s2334_s6 + $0x90] sm:$0xff] %vm1132_vm3, %v1118_v46  ;;  %v667_v24 = vpop.xlane.xlu1 %666  ;;  %v665_v36 = vpop.xlane.xlu0 %664 }
 0x258   :  { %v768_v37 = vpop.xlane.xlu1 %767  ;;  %v766_v4 = vpop.xlane.xlu0 %765 }
 0x259   :  { %v1017_v23 = vsel %vm999_vm0, %v667_v24, %v768_v37  ;;  %v1016_v28 = vsel %vm999_vm0, %v665_v36, %v766_v4 }
 0x25c   :  { %v869_v11 = vpop.xlane.xlu1 %868  ;;  %v867_v19 = vpop.xlane.xlu0 %866 }
 0x25d   :  { %v1050_v52 = vsel %vm1032_vm1, %v1017_v23, %v869_v11  ;;  %v1049_v45 = vsel %vm1032_vm1, %v1016_v28, %v867_v19 }
 0x260   :  { %v970_v0 = vpop.xlane.xlu1 %969  ;;  %v968_v7 = vpop.xlane.xlu0 %967 }
 0x261   :  { %v1083_v17 = vsel %vm1065_vm2, %v1050_v52, %v970_v0  ;;  %v1082_v59 = vsel %vm1065_vm2, %v1049_v45, %v968_v7 }
 0x262   :  { %v1117_v22 = vadd.f32 %v2019_v31, %v1083_v17  ;;  %v1116_v54 = vadd.f32 %v2019_v31, %v1082_v59 }
 0x264   :  { %1150 = vst.msk [vmem:[%s2334_s6 + $0x88] sm:$0xff] %vm1132_vm3, %v1117_v22  ;;  %1149 = vst.msk [vmem:[%s2334_s6 + $0x80] sm:$0xff] %vm1132_vm3, %v1116_v54  ;;  %v679_v21 = vpop.xlane.xlu1 %678  ;;  %v677_v29 = vpop.xlane.xlu0 %676 }
 0x268   :  { %v780_v27 = vpop.xlane.xlu1 %779  ;;  %v778_v20 = vpop.xlane.xlu0 %777 }
 0x269   :  { %v1023_v53 = vsel %vm999_vm0, %v679_v21, %v780_v27  ;;  %v1022_v13 = vsel %vm999_vm0, %v677_v29, %v778_v20 }
 0x26c   :  { %v881_v51 = vpop.xlane.xlu1 %880  ;;  %v879_v55 = vpop.xlane.xlu0 %878 }
 0x26d   :  { %v1056_v25 = vsel %vm1032_vm1, %v1023_v53, %v881_v51  ;;  %v1055_v14 = vsel %vm1032_vm1, %v1022_v13, %v879_v55 }
 0x270   :  { %v982_v40 = vpop.xlane.xlu1 %981  ;;  %v980_v30 = vpop.xlane.xlu0 %979 }
 0x271   :  { %v1089_v39 = vsel %vm1065_vm2, %v1056_v25, %v982_v40  ;;  %v1088_v48 = vsel %vm1065_vm2, %v1055_v14, %v980_v30 }
 0x272   :  { %v1123_v61 = vadd.f32 %v2019_v31, %v1089_v39  ;;  %v1122_v26 = vadd.f32 %v2019_v31, %v1088_v48 }
 0x274   :  { %1156 = vst.msk [vmem:[%s2334_s6 + $0xb8] sm:$0xff] %vm1132_vm3, %v1123_v61  ;;  %1155 = vst.msk [vmem:[%s2334_s6 + $0xb0] sm:$0xff] %vm1132_vm3, %v1122_v26  ;;  %v675_v34 = vpop.xlane.xlu1 %674  ;;  %v673_v57 = vpop.xlane.xlu0 %672 }
 0x278   :  { %v776_v58 = vpop.xlane.xlu1 %775  ;;  %v774_v60 = vpop.xlane.xlu0 %773 }
 0x279   :  { %v1021_v62 = vsel %vm999_vm0, %v675_v34, %v776_v58  ;;  %v1020_v3 = vsel %vm999_vm0, %v673_v57, %v774_v60 }
 0x27c   :  { %v877_v2 = vpop.xlane.xlu1 %876  ;;  %v875_v49 = vpop.xlane.xlu0 %874 }
 0x27d   :  { %v1054_v5 = vsel %vm1032_vm1, %v1021_v62, %v877_v2  ;;  %v1053_v6 = vsel %vm1032_vm1, %v1020_v3, %v875_v49 }
 0x280   :  { %v978_v8 = vpop.xlane.xlu1 %977  ;;  %v976_v9 = vpop.xlane.xlu0 %975 }
 0x281   :  { %v1087_v10 = vsel %vm1065_vm2, %v1054_v5, %v978_v8  ;;  %v1086_v15 = vsel %vm1065_vm2, %v1053_v6, %v976_v9 }
 0x282   :  { %v1121_v16 = vadd.f32 %v2019_v31, %v1087_v10  ;;  %v1120_v18 = vadd.f32 %v2019_v31, %v1086_v15 }
 0x284   :  { %1154 = vst.msk [vmem:[%s2334_s6 + $0xa8] sm:$0xff] %vm1132_vm3, %v1121_v16  ;;  %1153 = vst.msk [vmem:[%s2334_s6 + $0xa0] sm:$0xff] %vm1132_vm3, %v1120_v18  ;;  %v687_v32 = vpop.xlane.xlu1 %686  ;;  %v685_v50 = vpop.xlane.xlu0 %684 }
 0x288   :  { %v788_v43 = vpop.xlane.xlu1 %787  ;;  %v786_v44 = vpop.xlane.xlu0 %785 }
 0x289   :  { %v1027_v33 = vsel %vm999_vm0, %v687_v32, %v788_v43  ;;  %v1026_v41 = vsel %vm999_vm0, %v685_v50, %v786_v44 }
 0x28c   :  { %v889_v63 = vpop.xlane.xlu1 %888  ;;  %v887_v1 = vpop.xlane.xlu0 %886 }
 0x28d   :  { %v1060_v42 = vsel %vm1032_vm1, %v1027_v33, %v889_v63  ;;  %v1059_v47 = vsel %vm1032_vm1, %v1026_v41, %v887_v1 }
 0x290   :  { %v990_v35 = vpop.xlane.xlu1 %989  ;;  %v988_v12 = vpop.xlane.xlu0 %987 }
 0x291   :  { %v1093_v56 = vsel %vm1065_vm2, %v1060_v42, %v990_v35  ;;  %v1092_v38 = vsel %vm1065_vm2, %v1059_v47, %v988_v12 }
 0x292   :  { %v1127_v46 = vadd.f32 %v2019_v31, %v1093_v56  ;;  %v1126_v24 = vadd.f32 %v2019_v31, %v1092_v38 }
 0x294   :  { %1160 = vst.msk [vmem:[%s2334_s6 + $0xd8] sm:$0xff] %vm1132_vm3, %v1127_v46  ;;  %1159 = vst.msk [vmem:[%s2334_s6 + $0xd0] sm:$0xff] %vm1132_vm3, %v1126_v24  ;;  %v683_v36 = vpop.xlane.xlu1 %682  ;;  %v681_v37 = vpop.xlane.xlu0 %680 }
 0x298   :  { %v784_v4 = vpop.xlane.xlu1 %783  ;;  %v782_v11 = vpop.xlane.xlu0 %781 }
 0x299   :  { %v1025_v28 = vsel %vm999_vm0, %v683_v36, %v784_v4  ;;  %v1024_v52 = vsel %vm999_vm0, %v681_v37, %v782_v11 }
 0x29c   :  { %v885_v19 = vpop.xlane.xlu1 %884  ;;  %v883_v23 = vpop.xlane.xlu0 %882 }
 0x29d   :  { %v1058_v45 = vsel %vm1032_vm1, %v1025_v28, %v885_v19  ;;  %v1057_v0 = vsel %vm1032_vm1, %v1024_v52, %v883_v23 }
 0x2a0   :  { %v986_v7 = vpop.xlane.xlu1 %985  ;;  %v984_v17 = vpop.xlane.xlu0 %983 }
 0x2a1   :  { %v1091_v59 = vsel %vm1065_vm2, %v1058_v45, %v986_v7  ;;  %v1090_v22 = vsel %vm1065_vm2, %v1057_v0, %v984_v17 }
 0x2a2   :  { %v1125_v54 = vadd.f32 %v2019_v31, %v1091_v59  ;;  %v1124_v21 = vadd.f32 %v2019_v31, %v1090_v22 }
 0x2a4   :  { %1158 = vst.msk [vmem:[%s2334_s6 + $0xc8] sm:$0xff] %vm1132_vm3, %v1125_v54  ;;  %1157 = vst.msk [vmem:[%s2334_s6 + $0xc0] sm:$0xff] %vm1132_vm3, %v1124_v21  ;;  %v695_v29 = vpop.xlane.xlu1 %694  ;;  %v693_v27 = vpop.xlane.xlu0 %692 }
 0x2a8   :  { %v796_v20 = vpop.xlane.xlu1 %795  ;;  %v794_v51 = vpop.xlane.xlu0 %793 }
 0x2a9   :  { %v1031_v3 = vsel %vm999_vm0, %v695_v29, %v796_v20  ;;  %v1030_v5 = vsel %vm999_vm0, %v693_v27, %v794_v51 }
 0x2ac   :  { %v897_v55 = vpop.xlane.xlu1 %896  ;;  %v895_v53 = vpop.xlane.xlu0 %894 }
 0x2ad   :  { %v1064_v6 = vsel %vm1032_vm1, %v1031_v3, %v897_v55  ;;  %v1063_v8 = vsel %vm1032_vm1, %v1030_v5, %v895_v53 }
 0x2b0   :  { %v691_v13 = vpop.xlane.xlu1 %690  ;;  %v689_v25 = vpop.xlane.xlu0 %688 }
 0x2b4   :  { %v792_v14 = vpop.xlane.xlu1 %791  ;;  %v790_v40 = vpop.xlane.xlu0 %789 }
 0x2b5   :  { %v1029_v48 = vsel %vm999_vm0, %v691_v13, %v792_v14  ;;  %v1028_v61 = vsel %vm999_vm0, %v689_v25, %v790_v40 }
 0x2b8   :  { %v893_v30 = vpop.xlane.xlu1 %892  ;;  %v891_v39 = vpop.xlane.xlu0 %890 }
 0x2b9   :  { %v1062_v26 = vsel %vm1032_vm1, %v1029_v48, %v893_v30  ;;  %v1061_v34 = vsel %vm1032_vm1, %v1028_v61, %v891_v39 }
 0x2bc   :  { %v994_v57 = vpop.xlane.xlu1 %993  ;;  %v992_v58 = vpop.xlane.xlu0 %991 }
 0x2bd   :  { %v1095_v60 = vsel %vm1065_vm2, %v1062_v26, %v994_v57  ;;  %v1094_v2 = vsel %vm1065_vm2, %v1061_v34, %v992_v58 }
 0x2be   :  { %v1129_v49 = vadd.f32 %v2019_v31, %v1095_v60  ;;  %v1128_v62 = vadd.f32 %v2019_v31, %v1094_v2 }
 0x2c0   :  { %1162 = vst.msk [vmem:[%s2334_s6 + $0xe8] sm:$0xff] %vm1132_vm3, %v1129_v49  ;;  %1161 = vst.msk [vmem:[%s2334_s6 + $0xe0] sm:$0xff] %vm1132_vm3, %v1128_v62  ;;  %v998_v9 = vpop.xlane.xlu1 %997  ;;  %v996_v10 = vpop.xlane.xlu0 %995 }
 0x2c1   :  { %v1097_v15 = vsel %vm1065_vm2, %v1064_v6, %v998_v9  ;;  %v1096_v16 = vsel %vm1065_vm2, %v1063_v8, %v996_v10 }
 0x2c2   :  { %v1131_v18 = vadd.f32 %v2019_v31, %v1097_v15  ;;  %v1130_v32 = vadd.f32 %v2019_v31, %v1096_v16 }
 0x2c4   :  { %1164 = vst.msk [vmem:[%s2334_s6 + $0xf8] sm:$0xff] %vm1132_vm3, %v1131_v18  ;;  %1163 = vst.msk [vmem:[%s2334_s6 + $0xf0] sm:$0xff] %vm1132_vm3, %v1130_v32 }
 0x2c5   :  { %1169 = vsyncpa [#allocation4], 1 }
 0x2c6   :  { %1170 = vsyncpa [#allocation6], 1 }

</bundles_post_ra>
